<compile_context>
chip_gen: v7x
topology: tpu7x:2x2x1
jax: 0.10.0
libtpu: 0.0.40
codegen_flags: <defaults>
</compile_context>

<pallas_src>
import functools
import math

import jax
import jax.numpy as jnp
from jax.experimental import pallas as pl
from jax.experimental.pallas import tpu as pltpu


def _round_up(x, m):
    return ((x + m - 1) // m) * m


# ----------------------------------------------------------------------------
# Pallas kernel 1: tiled bf16 MXU matmul with f32 accumulation and an
# optional fused epilogue (bias add / residual add at the last K step).
# ----------------------------------------------------------------------------
def _mm_kernel(*args, has_bias, has_res):
    a_ref, b_ref = args[0], args[1]
    idx = 2
    bias_ref = None
    res_ref = None
    if has_bias:
        bias_ref = args[idx]
        idx += 1
    if has_res:
        res_ref = args[idx]
        idx += 1
    o_ref, acc_ref = args[idx], args[idx + 1]

    @pl.when(pl.program_id(2) == 0)
    def _():
        acc_ref[...] = jnp.zeros_like(acc_ref)

    acc_ref[...] += jnp.dot(a_ref[...], b_ref[...],
                            preferred_element_type=jnp.float32)

    @pl.when(pl.program_id(2) == pl.num_programs(2) - 1)
    def _():
        out = acc_ref[...]
        if has_bias:
            out = out + bias_ref[...]
        if has_res:
            out = out + res_ref[...]
        o_ref[...] = out.astype(o_ref.dtype)


@jax.jit
def pallas_matmul(a, b, bias=None, residual=None):
    """a: (M, K), b: (K, N) -> (M, N) f32 (+ bias (N,) and/or residual (M, N)).
    Operands fed to the MXU in bf16; accumulation and epilogue in f32."""
    M, K = a.shape
    _, N = b.shape
    a = a.astype(jnp.bfloat16)
    b = b.astype(jnp.bfloat16)
    TM = min(1024, _round_up(M, 8))
    TK = K if K <= 512 else 512
    TN = N if N <= 256 else 256
    Mp, Kp, Np = _round_up(M, TM), _round_up(K, TK), _round_up(N, TN)
    if (Mp, Kp) != (M, K):
        a = jnp.pad(a, ((0, Mp - M), (0, Kp - K)))
    if (Kp, Np) != (K, N):
        b = jnp.pad(b, ((0, Kp - K), (0, Np - N)))

    in_specs = [pl.BlockSpec((TM, TK), lambda i, j, k: (i, k)),
                pl.BlockSpec((TK, TN), lambda i, j, k: (k, j))]
    args = [a, b]
    if bias is not None:
        bias = bias.reshape(1, N).astype(jnp.float32)
        if Np != N:
            bias = jnp.pad(bias, ((0, 0), (0, Np - N)))
        in_specs.append(pl.BlockSpec((1, TN), lambda i, j, k: (0, j)))
        args.append(bias)
    if residual is not None:
        residual = residual.astype(jnp.float32)
        if (Mp, Np) != (M, N):
            residual = jnp.pad(residual, ((0, Mp - M), (0, Np - N)))
        in_specs.append(pl.BlockSpec((TM, TN), lambda i, j, k: (i, j)))
        args.append(residual)

    out = pl.pallas_call(
        functools.partial(_mm_kernel, has_bias=bias is not None,
                          has_res=residual is not None),
        out_shape=jax.ShapeDtypeStruct((Mp, Np), jnp.float32),
        grid_spec=pltpu.PrefetchScalarGridSpec(
            num_scalar_prefetch=0,
            grid=(Mp // TM, Np // TN, Kp // TK),
            in_specs=in_specs,
            out_specs=pl.BlockSpec((TM, TN), lambda i, j, k: (i, j)),
            scratch_shapes=[pltpu.VMEM((TM, TN), jnp.float32)]),
        compiler_params=pltpu.CompilerParams(
            dimension_semantics=("parallel", "parallel", "arbitrary")),
    )(*args)
    if (Mp, Np) != (M, N):
        out = out[:M, :N]
    return out


# ----------------------------------------------------------------------------
# Tiling helpers for the spatial (elementwise / reduction) kernels
# ----------------------------------------------------------------------------
def _spatial_tile(hw, c, cap_elems=262144):
    """Largest power-of-two divisor of hw with tile elements <= cap."""
    cap = max(8, cap_elems // max(c, 1))
    t = 1
    while t * 2 <= min(hw, cap) and hw % (t * 2) == 0:
        t *= 2
    return t


def _pack_factor(hw, c):
    """Pack k spatial rows into the lane dim when C is small (lane-dense)."""
    k = 1
    while c * k * 2 <= 128 and hw % (k * 2) == 0:
        k *= 2
    return k


# ----------------------------------------------------------------------------
# Pallas kernel 2: per-(b, c) moments over the spatial axis
# ----------------------------------------------------------------------------
def _stats_kernel(x_ref, s_ref, ss_ref):
    @pl.when(pl.program_id(1) == 0)
    def _():
        s_ref[...] = jnp.zeros_like(s_ref)
        ss_ref[...] = jnp.zeros_like(ss_ref)

    x = x_ref[...]
    s_ref[...] += jnp.sum(x, axis=1, keepdims=True)
    ss_ref[...] += jnp.sum(x * x, axis=1, keepdims=True)


@jax.jit
def pallas_moments(x):
    """x: (B, HW, C) f32 -> (mean, biased var) of shape (B, C) over HW."""
    B, HW, C = x.shape
    k = _pack_factor(HW, C)
    xp = x.reshape(B, HW // k, k * C) if k > 1 else x
    _, HWp, Cp = xp.shape
    T = _spatial_tile(HWp, Cp)
    s, ss = pl.pallas_call(
        _stats_kernel,
        out_shape=(jax.ShapeDtypeStruct((B, 1, Cp), jnp.float32),
                   jax.ShapeDtypeStruct((B, 1, Cp), jnp.float32)),
        grid_spec=pltpu.PrefetchScalarGridSpec(
            num_scalar_prefetch=0,
            grid=(B, HWp // T),
            in_specs=[pl.BlockSpec((1, T, Cp), lambda b, t: (b, t, 0))],
            out_specs=(pl.BlockSpec((1, 1, Cp), lambda b, t: (b, 0, 0)),
                       pl.BlockSpec((1, 1, Cp), lambda b, t: (b, 0, 0)))),
        compiler_params=pltpu.CompilerParams(
            dimension_semantics=("parallel", "arbitrary")),
    )(xp)
    s = s[:, 0, :]
    ss = ss[:, 0, :]
    if k > 1:
        s = s.reshape(B, k, C).sum(axis=1)
        ss = ss.reshape(B, k, C).sum(axis=1)
    mean = s / HW
    var = jnp.maximum(ss / HW - mean * mean, 0.0)   # clamp E[x^2]-E[x]^2 >= 0
    return mean, var


# ----------------------------------------------------------------------------
# Pallas kernel 3: fused normalize + LeakyReLU (BatchNorm application)
# ----------------------------------------------------------------------------
def _norm_act_kernel(x_ref, mean_ref, invstd_ref, o_ref, *, alpha):
    xn = (x_ref[...] - mean_ref[...]) * invstd_ref[...]
    o_ref[...] = jnp.where(xn >= 0, xn, alpha * xn)


@functools.partial(jax.jit, static_argnames=("alpha",))
def pallas_norm_act(x, mean, invstd, alpha=0.1):
    """x: (B, HW, C); mean/invstd: (B, 1, C)."""
    B, HW, C = x.shape
    k = _pack_factor(HW, C)
    if k > 1:
        x = x.reshape(B, HW // k, k * C)
        mean = jnp.tile(mean, (1, 1, k))
        invstd = jnp.tile(invstd, (1, 1, k))
    _, HWp, Cp = x.shape
    T = _spatial_tile(HWp, Cp)
    out = pl.pallas_call(
        functools.partial(_norm_act_kernel, alpha=alpha),
        out_shape=jax.ShapeDtypeStruct((B, HWp, Cp), jnp.float32),
        grid_spec=pltpu.PrefetchScalarGridSpec(
            num_scalar_prefetch=0,
            grid=(B, HWp // T),
            in_specs=[pl.BlockSpec((1, T, Cp), lambda b, t: (b, t, 0)),
                      pl.BlockSpec((1, 1, Cp), lambda b, t: (b, 0, 0)),
                      pl.BlockSpec((1, 1, Cp), lambda b, t: (b, 0, 0))],
            out_specs=pl.BlockSpec((1, T, Cp), lambda b, t: (b, t, 0))),
        compiler_params=pltpu.CompilerParams(
            dimension_semantics=("parallel", "parallel")),
    )(x, mean, invstd)
    return out.reshape(B, HW, C)


# ----------------------------------------------------------------------------
# Pallas kernel 4: fused AADLayer
#   instance-norm apply + in-kernel 1x1 attr convs (MXU) + id modulation
#   + conv_h mask + sigmoid blend + optional ReLU + mask-mean reduction.
# ----------------------------------------------------------------------------
def _aad_fuse_kernel(h_ref, mean_ref, invstd_ref, za_ref, w1_ref, b1_ref,
                     w2_ref, b2_ref, gid_ref, bid_ref, wh_ref, bh_ref,
                     o_ref, msum_ref, *, apply_relu):
    @pl.when(pl.program_id(1) == 0)
    def _():
        msum_ref[...] = jnp.zeros_like(msum_ref)

    hn = (h_ref[0] - mean_ref[0]) * invstd_ref[0]          # (T, C)
    za = za_ref[0]                                          # (T, Ca) bf16
    # fused 1x1 attr convs (gamma_attr / beta_attr) on the MXU
    gamma_a = jnp.dot(za, w1_ref[...],
                      preferred_element_type=jnp.float32) + b1_ref[0]
    beta_a = jnp.dot(za, w2_ref[...],
                     preferred_element_type=jnp.float32) + b2_ref[0]
    a = gamma_a * hn + beta_a
    i = gid_ref[0] * hn + bid_ref[0]
    # conv_h: 1x1 conv to a single channel == per-row dot over C
    ml = jnp.sum(hn * wh_ref[0], axis=-1, keepdims=True) + bh_ref[0]   # (T, 1)
    m = jax.nn.sigmoid(ml)
    out = (1.0 - m) * a + m * i
    if apply_relu:
        out = jnp.maximum(out, 0.0)
    o_ref[...] = out[None]
    # lane-dense running sum of (1 - M), finished as a mean in the wrapper
    part = jnp.sum(1.0 - m, axis=0, keepdims=True)          # (1, 1)
    msum_ref[...] += jnp.broadcast_to(part[None], (1, 1, 128))


@functools.partial(jax.jit, static_argnames=("apply_relu",))
def pallas_aad_fuse(h, mean, invstd, za, w1, b1, w2, b2, gid, bid, wh, bh,
                    apply_relu=True):
    """h: (B,HW,C) f32; za: (B,HW,Ca) bf16; w1/w2: (Ca,C) bf16;
    b1/b2/gid/bid/mean/invstd: (.,1,C); wh: (1,1,C); bh: (1,1,1).
    Returns (out (B,HW,C) f32, sum over HW of (1 - sigmoid(mask)) (B,))."""
    B, HW, C = h.shape
    Ca = za.shape[-1]
    T = _spatial_tile(HW, max(C, Ca), cap_elems=65536)
    big_h = pl.BlockSpec((1, T, C), lambda b, t: (b, t, 0))
    big_a = pl.BlockSpec((1, T, Ca), lambda b, t: (b, t, 0))
    per_c = pl.BlockSpec((1, 1, C), lambda b, t: (b, 0, 0))
    w_c = pl.BlockSpec((Ca, C), lambda b, t: (0, 0))
    one_c = pl.BlockSpec((1, 1, C), lambda b, t: (0, 0, 0))
    one_1 = pl.BlockSpec((1, 1, 1), lambda b, t: (0, 0, 0))
    out, msum = pl.pallas_call(
        functools.partial(_aad_fuse_kernel, apply_relu=apply_relu),
        out_shape=(jax.ShapeDtypeStruct((B, HW, C), jnp.float32),
                   jax.ShapeDtypeStruct((B, 1, 128), jnp.float32)),
        grid_spec=pltpu.PrefetchScalarGridSpec(
            num_scalar_prefetch=0,
            grid=(B, HW // T),
            in_specs=[big_h, per_c, per_c, big_a, w_c, one_c,
                      w_c, one_c, per_c, per_c, one_c, one_1],
            out_specs=(big_h,
                       pl.BlockSpec((1, 1, 128), lambda b, t: (b, 0, 0)))),
        compiler_params=pltpu.CompilerParams(
            dimension_semantics=("parallel", "arbitrary")),
    )(h, mean, invstd, za, w1, b1, w2, b2, gid, bid, wh, bh)
    return out, msum[:, 0, 0]


# ----------------------------------------------------------------------------
# Conv / deconv / linear wrappers (glue + Pallas matmul)
# ----------------------------------------------------------------------------
@functools.partial(jax.jit, static_argnames=("stride", "padding"))
def conv2d(x, w, b=None, stride=1, padding=0, residual=None):
    """x: (B,H,W,Cin); w: (KH,KW,Cin,Cout) [HWIO]. bias / residual add fused
    into the Pallas matmul epilogue."""
    B, H, W, Cin = x.shape
    KH, KW, _, Cout = w.shape
    xb = x.astype(jnp.bfloat16)
    if padding:
        xb = jnp.pad(xb, ((0, 0), (padding, padding), (padding, padding),
                          (0, 0)))
    OH = (H + 2 * padding - KH) // stride + 1
    OW = (W + 2 * padding - KW) // stride + 1
    # TODO(synk): fold KH*KW into the matmul K grid axis (shifted windows via
    # manual DMA) instead of materializing this bf16 patch tensor.
    patches = [xb[:, kh:kh + stride * OH:stride, kw:kw + stride * OW:stride, :]
               for kh in range(KH) for kw in range(KW)]
    a = jnp.stack(patches, axis=3).reshape(B * OH * OW, KH * KW * Cin)
    wm = w.reshape(KH * KW * Cin, Cout).astype(jnp.bfloat16)
    bias = None if b is None else b.reshape(1, Cout)
    res = None if residual is None else residual.reshape(B * OH * OW, Cout)
    y = pallas_matmul(a, wm, bias=bias, residual=res)
    return y.reshape(B, OH, OW, Cout)


@functools.partial(jax.jit, static_argnames=("stride", "padding"))
def conv_transpose2d(x, w, b=None, stride=2, padding=1):
    """PyTorch ConvTranspose2d semantics. x: (B,H,W,Cin); w: (KH,KW,Cin,Cout)."""
    B, H, W, Cin = x.shape
    KH, KW, _, Cout = w.shape
    a = x.reshape(B * H * W, Cin).astype(jnp.bfloat16)
    wm = jnp.transpose(w, (2, 0, 1, 3)).reshape(Cin, KH * KW * Cout)
    taps = pallas_matmul(a, wm).reshape(B, H, W, KH, KW, Cout)
    FH = stride * (H - 1) + KH
    FW = stride * (W - 1) + KW
    if stride == 1:
        y = jnp.zeros((B, FH, FW, Cout), jnp.float32)
        for kh in range(KH):
            for kw in range(KW):
                y = y + jnp.pad(taps[:, :, :, kh, kw, :],
                                ((0, 0), (kh, FH - H - kh),
                                 (kw, FW - W - kw), (0, 0)))
    else:
        # stride-2 4x4: group taps by output parity -> four disjoint
        # interleaves assembled with pad/add + one reshape (no RMW scatter).
        assert stride == 2 and KH == 4 and KW == 4
        Hs, Ws = H + 1, W + 1
        parts = []
        for r in range(2):
            row = []
            for c in range(2):
                acc = jnp.zeros((B, Hs, Ws, Cout), jnp.float32)
                for ah in range(2):
                    for aw in range(2):
                        t = taps[:, :, :, 2 * ah + r, 2 * aw + c, :]
                        acc = acc + jnp.pad(
                            t, ((0, 0), (ah, 1 - ah), (aw, 1 - aw), (0, 0)))
                row.append(acc)
            parts.append(row)
        inter = jnp.stack(
            [jnp.stack([parts[r][c] for c in range(2)], axis=3)
             for r in range(2)], axis=2)           # (B, Hs, 2, Ws, 2, Cout)
        y = inter.reshape(B, 2 * Hs, 2 * Ws, Cout)
    OH, OW = FH - 2 * padding, FW - 2 * padding
    y = y[:, padding:padding + OH, padding:padding + OW, :]
    if b is not None:
        y = y + b
    return y


def linear(x, w, b):
    return pallas_matmul(x, w, bias=b)


# TODO(synk): bilinear x2 upsampling (align_corners=True) uses gathers with
# fractional weights; kept in plain JAX (no clean Pallas gather path here).
@jax.jit
def bilinear_up2(x):
    B, H, W, C = x.shape

    def idx_w(n_in, n_out):
        if n_in == 1:
            z = jnp.zeros((n_out,), jnp.int32)
            return z, z, jnp.zeros((n_out,), jnp.float32)
        pos = jnp.arange(n_out, dtype=jnp.float32) * (n_in - 1) / (n_out - 1)
        lo = jnp.clip(jnp.floor(pos).astype(jnp.int32), 0, n_in - 2)
        w = pos - lo.astype(jnp.float32)
        return lo, lo + 1, w

    lo_h, hi_h, wh = idx_w(H, 2 * H)
    lo_w, hi_w, ww = idx_w(W, 2 * W)
    xr = (x[:, lo_h] * (1.0 - wh)[None, :, None, None]
          + x[:, hi_h] * wh[None, :, None, None])
    xc = (xr[:, :, lo_w] * (1.0 - ww)[None, None, :, None]
          + xr[:, :, hi_w] * ww[None, None, :, None])
    return xc


# ----------------------------------------------------------------------------
# Normalization blocks
# ----------------------------------------------------------------------------
def batchnorm_lrelu(y, alpha=0.1, eps=1e-5):
    """BatchNorm2d (train-mode batch stats, weight=1, bias=0) + LeakyReLU."""
    B, H, W, C = y.shape
    mean, var = pallas_moments(y.reshape(1, B * H * W, C))
    invstd = 1.0 / jnp.sqrt(var + eps)
    out = pallas_norm_act(
        y.reshape(B, H * W, C),
        jnp.broadcast_to(mean[:, None, :], (B, 1, C)),
        jnp.broadcast_to(invstd[:, None, :], (B, 1, C)), alpha=alpha)
    return out.reshape(B, H, W, C)


# ----------------------------------------------------------------------------
# AAD layer / residual block / generator / encoder
# ----------------------------------------------------------------------------
def aad_layer(h, z_attr, z_id, p, apply_relu=True, eps=1e-5):
    B, H, W, C = h.shape
    HW = H * W
    h_flat = h.reshape(B, HW, C)

    mean, var = pallas_moments(h_flat)                 # InstanceNorm stats
    invstd = 1.0 / jnp.sqrt(var + eps)

    # fc1 & fc2 fused into a single matmul (weights concatenated along N)
    gb = linear(z_id, p["fc_w"], p["fc_b"])            # (B, 2C)
    gamma_id, beta_id = gb[:, :C], gb[:, C:]

    Ca = z_attr.shape[-1]
    za = z_attr.reshape(B, HW, Ca).astype(jnp.bfloat16)

    out, msum = pallas_aad_fuse(
        h_flat, mean[:, None, :], invstd[:, None, :], za,
        p["conv1_w"], p["conv1_b"].reshape(1, 1, C),
        p["conv2_w"], p["conv2_b"].reshape(1, 1, C),
        gamma_id[:, None, :], beta_id[:, None, :],
        p["convh_w"].reshape(1, 1, C), p["convh_b"].reshape(1, 1, 1),
        apply_relu=apply_relu)

    m = msum / HW                                      # mean(1 - M) per batch
    return out.reshape(B, H, W, C), m


def aad_resblk(h, z_attr, z_id, p):
    x, m1 = aad_layer(h, z_attr, z_id, p["aad1"], apply_relu=True)
    x = conv2d(x, p["conv1_w"], stride=1, padding=1)
    x, m2 = aad_layer(x, z_attr, z_id, p["aad2"], apply_relu=True)
    m = m1 + m2
    if "aad3" in p:
        hh, m3 = aad_layer(h, z_attr, z_id, p["aad3"], apply_relu=True)
        hh = conv2d(hh, p["conv3_w"], stride=1, padding=1)
        m = m + m3
    else:
        hh = h
    # residual add (x + h) fused into the conv2 matmul epilogue
    x = conv2d(x, p["conv2_w"], stride=1, padding=1, residual=hh)
    return x, m


def encoder_forward(p, xt):
    feats = []
    x = xt
    for w in p["convs"]:                               # conv4x4 blocks
        x = batchnorm_lrelu(conv2d(x, w, stride=2, padding=1))
        feats.append(x)
    zs = [feats[6]]
    skips = [feats[5], feats[4], feats[3], feats[2], feats[1], feats[0]]
    z = feats[6]
    for w, skip in zip(p["deconvs"], skips):           # deconv4x4 blocks
        y = conv_transpose2d(z, w, stride=2, padding=1)
        y = batchnorm_lrelu(y)
        z = jnp.concatenate([y, skip], axis=-1)
        zs.append(z)
    zs.append(bilinear_up2(zs[-1]))                    # z_attr8
    return tuple(zs)


def generator_forward(p, z_attr, z_id):
    B = z_id.shape[0]
    x = z_id.reshape(B, 1, 1, -1)
    h = conv_transpose2d(x, p["up1_w"], p["up1_b"], stride=1, padding=0)
    ms = []
    for i, (blk_p, za) in enumerate(zip(p["blocks"], z_attr)):
        h, mi = aad_resblk(h, za, z_id, blk_p)
        ms.append(mi)
        if i < 7:
            h = bilinear_up2(h)
    y = jnp.tanh(h)
    m_out = ms[5] + ms[6] + ms[7]
    return y, m_out


@jax.jit
def aei_net_forward(params, Xt_nchw, z_id):
    xt = jnp.transpose(Xt_nchw, (0, 2, 3, 1)).astype(jnp.float32)  # -> NHWC
    attr = encoder_forward(params["enc"], xt)
    y, m = generator_forward(params["gen"], attr, z_id)
    Y = jnp.transpose(y, (0, 3, 1, 2))                             # -> NCHW
    attr_nchw = tuple(jnp.transpose(a, (0, 3, 1, 2)) for a in attr)
    return Y, attr_nchw, m


# ----------------------------------------------------------------------------
# Deterministic parameter initialization (shapes follow the PyTorch module;
# width_div=1, c_id=512 gives the exact PyTorch AEI_Net channel widths).
# ----------------------------------------------------------------------------
class KeyGen:
    def __init__(self, seed=0):
        self.key = jax.random.PRNGKey(seed)

    def __call__(self):
        self.key, sub = jax.random.split(self.key)
        return sub


def xavier_conv(kg, kh, kw, cin, cout):
    fan_in, fan_out = cin * kh * kw, cout * kh * kw
    std = math.sqrt(2.0 / (fan_in + fan_out))
    return std * jax.random.normal(kg(), (kh, kw, cin, cout), jnp.float32)


def init_aad_layer(kg, cx, ca, cid):
    fc1 = 0.001 * jax.random.normal(kg(), (cid, cx), jnp.float32)
    fc2 = 0.001 * jax.random.normal(kg(), (cid, cx), jnp.float32)
    return dict(
        conv1_w=xavier_conv(kg, 1, 1, ca, cx).reshape(ca, cx)
        .astype(jnp.bfloat16),
        conv1_b=jnp.zeros((cx,), jnp.float32),
        conv2_w=xavier_conv(kg, 1, 1, ca, cx).reshape(ca, cx)
        .astype(jnp.bfloat16),
        conv2_b=jnp.zeros((cx,), jnp.float32),
        # fc1 / fc2 concatenated along N -> one fused id-modulation matmul
        fc_w=jnp.concatenate([fc1, fc2], axis=1).astype(jnp.bfloat16),
        fc_b=jnp.zeros((2 * cx,), jnp.float32),
        convh_w=xavier_conv(kg, 1, 1, cx, 1).reshape(cx),
        convh_b=jnp.zeros((1,), jnp.float32),
    )


def init_resblk(kg, cin, cout, ca, cid):
    p = dict(
        aad1=init_aad_layer(kg, cin, ca, cid),
        conv1_w=xavier_conv(kg, 3, 3, cin, cin).astype(jnp.bfloat16),
        aad2=init_aad_layer(kg, cin, ca, cid),
        conv2_w=xavier_conv(kg, 3, 3, cin, cout).astype(jnp.bfloat16),
    )
    if cin != cout:
        p["aad3"] = init_aad_layer(kg, cin, ca, cid)
        p["conv3_w"] = xavier_conv(kg, 3, 3, cin, cout).astype(jnp.bfloat16)
    return p


def init_params(c_id=512, width_div=1, seed=0):
    kg = KeyGen(seed)
    d = width_div

    def ch(c):
        return max(4, c // d)

    enc_conv_ch = [(3, ch(32)), (ch(32), ch(64)), (ch(64), ch(128)),
                   (ch(128), ch(256)), (ch(256), ch(512)),
                   (ch(512), ch(1024)), (ch(1024), ch(1024))]
    enc_deconv_ch = [(ch(1024), ch(1024)), (2 * ch(1024), ch(512)),
                     (2 * ch(512), ch(256)), (2 * ch(256), ch(128)),
                     (2 * ch(128), ch(64)), (2 * ch(64), ch(32))]
    enc = dict(
        convs=[xavier_conv(kg, 4, 4, i, o).astype(jnp.bfloat16)
               for i, o in enc_conv_ch],
        deconvs=[xavier_conv(kg, 4, 4, i, o).astype(jnp.bfloat16)
                 for i, o in enc_deconv_ch],
    )
    blk_cfg = [(ch(1024), ch(1024), ch(1024)),
               (ch(1024), ch(1024), 2 * ch(1024)),
               (ch(1024), ch(1024), 2 * ch(512)),
               (ch(1024), ch(512), 2 * ch(256)),
               (ch(512), ch(256), 2 * ch(128)),
               (ch(256), ch(128), 2 * ch(64)),
               (ch(128), ch(64), 2 * ch(32)),
               (ch(64), 3, 2 * ch(32))]
    gen = dict(
        up1_w=xavier_conv(kg, 2, 2, c_id, ch(1024)).astype(jnp.bfloat16),
        up1_b=jnp.zeros((ch(1024),), jnp.float32),
        blocks=[init_resblk(kg, cin, cout, ca, c_id)
                for cin, cout, ca in blk_cfg],
    )
    return dict(enc=enc, gen=gen)


# ----------------------------------------------------------------------------
if __name__ == "__main__":
    # 256x256 input is architecturally forced (7 stride-2 downsamples meet a
    # generator that starts from a 2x2 ConvTranspose).  Channel widths are
    # divided by WIDTH_DIV for a fast demo; WIDTH_DIV=1 / c_id=512 reproduces
    # the exact PyTorch AEI_Net sizes.
    B = 1
    WIDTH_DIV = 8
    C_ID = 512 // WIDTH_DIV
    key = jax.random.PRNGKey(0)
    k1, k2 = jax.random.split(key)
    Xt = jax.random.normal(k1, (B, 3, 256, 256), jnp.float32)   # NCHW like torch
    z_id = jax.random.normal(k2, (B, C_ID), jnp.float32)

    params = init_params(c_id=C_ID, width_div=WIDTH_DIV, seed=0)

    Y, attr, m = aei_net_forward(params, Xt, z_id)
    Y = jax.block_until_ready(Y)
    m = jax.block_until_ready(m)
    for a in attr:
        jax.block_until_ready(a)

    assert Y.shape == (B, 3, 256, 256)
    assert m.shape == (B,)
    assert attr[0].shape == (B, 1024 // WIDTH_DIV, 2, 2)
    assert attr[7].shape == (B, 64 // WIDTH_DIV, 256, 256)
    assert bool(jnp.all(jnp.isfinite(Y)))

    print("KERNEL_OK")
</pallas_src>

<mosaic_0001>
module attributes {stable_mosaic.version = 11 : i64} {
  func.func @_mm_kernel(%arg0: i32, %arg1: i32, %arg2: i32, %arg3: memref<1024x48xbf16, #tpu.memory_space<vmem>>, %arg4: memref<48x4xbf16, #tpu.memory_space<vmem>>, %arg5: memref<1024x4xf32, #tpu.memory_space<vmem>>, %arg6: memref<1024x4xf32, #tpu.memory_space<vmem>>) attributes {dimension_semantics = [#tpu.dimension_semantics<parallel>, #tpu.dimension_semantics<parallel>, #tpu.dimension_semantics<arbitrary>], iteration_bounds = array<i64: 16, 1, 1>, scalar_prefetch = 0 : i64, scratch_operands = 1 : i64, tpu.core_type = #tpu.core_type<tc>, window_params = [{transform_indices = @transform_0, window_bounds = array<i64: 1024, 48>}, {transform_indices = @transform_1, window_bounds = array<i64: 48, 4>}, {transform_indices = @transform_2, window_bounds = array<i64: 1024, 4>}]} {
    %c0_i32 = arith.constant 0 : i32
    %0 = arith.cmpi eq, %arg2, %c0_i32 : i32
    %1 = arith.extui %0 : i1 to i32
    %c0_i32_0 = arith.constant 0 : i32
    %2 = arith.cmpi ne, %1, %c0_i32_0 : i32
    scf.if %2 {
      %cst_10 = arith.constant 0.000000e+00 : f32
      %12 = vector.broadcast %cst_10 : f32 to vector<1024x4xf32>
      %c0_11 = arith.constant 0 : index
      %c0_12 = arith.constant 0 : index
      %13 = vector.load %arg6[%c0_11, %c0_12] : memref<1024x4xf32, #tpu.memory_space<vmem>>, vector<1024x4xf32>
      tpu.vector_store %arg6[%c0_11, %c0_12], %12 {strides = array<i32>} : memref<1024x4xf32, #tpu.memory_space<vmem>>, vector<1024x4xf32>,
    } else {
    }
    %c0 = arith.constant 0 : index
    %c0_1 = arith.constant 0 : index
    %3 = vector.load %arg6[%c0, %c0_1] : memref<1024x4xf32, #tpu.memory_space<vmem>>, vector<1024x4xf32>
    %c0_2 = arith.constant 0 : index
    %c0_3 = arith.constant 0 : index
    %4 = vector.load %arg3[%c0_2, %c0_3] : memref<1024x48xbf16, #tpu.memory_space<vmem>>, vector<1024x48xbf16>
    %c0_4 = arith.constant 0 : index
    %c0_5 = arith.constant 0 : index
    %5 = vector.load %arg4[%c0_4, %c0_5] : memref<48x4xbf16, #tpu.memory_space<vmem>>, vector<48x4xbf16>
    %cst = arith.constant dense<0.000000e+00> : vector<1024x4xf32>
    %6 = tpu.matmul %4, %5, %cst {dimension_numbers = #tpu.dot_dimension_numbers<[1], [0], [0], [1], [0, 0, 1, 1], [], []>} : vector<1024x48xbf16>, vector<48x4xbf16>, vector<1024x4xf32> -> vector<1024x4xf32>
    %7 = arith.addf %3, %6 : vector<1024x4xf32>
    %c0_6 = arith.constant 0 : index
    %c0_7 = arith.constant 0 : index
    %8 = vector.load %arg6[%c0_6, %c0_7] : memref<1024x4xf32, #tpu.memory_space<vmem>>, vector<1024x4xf32>
    tpu.vector_store %arg6[%c0_6, %c0_7], %7 {strides = array<i32>} : memref<1024x4xf32, #tpu.memory_space<vmem>>, vector<1024x4xf32>,
    %c0_i32_8 = arith.constant 0 : i32
    %9 = arith.cmpi eq, %arg2, %c0_i32_8 : i32
    %10 = arith.extui %9 : i1 to i32
    %c0_i32_9 = arith.constant 0 : i32
    %11 = arith.cmpi ne, %10, %c0_i32_9 : i32
    scf.if %11 {
      %c0_10 = arith.constant 0 : index
      %c0_11 = arith.constant 0 : index
      %12 = vector.load %arg6[%c0_10, %c0_11] : memref<1024x4xf32, #tpu.memory_space<vmem>>, vector<1024x4xf32>
      %c0_12 = arith.constant 0 : index
      %c0_13 = arith.constant 0 : index
      %13 = vector.load %arg5[%c0_12, %c0_13] : memref<1024x4xf32, #tpu.memory_space<vmem>>, vector<1024x4xf32>
      tpu.vector_store %arg5[%c0_12, %c0_13], %12 {strides = array<i32>} : memref<1024x4xf32, #tpu.memory_space<vmem>>, vector<1024x4xf32>,
    } else {
    }
    return
  }
  func.func @transform_0(%arg0: i32, %arg1: i32, %arg2: i32) -> (i32, i32) {
    %c0_i32 = arith.constant 0 : i32
    return %arg0, %arg2 : i32, i32
  }
  func.func @transform_1(%arg0: i32, %arg1: i32, %arg2: i32) -> (i32, i32) {
    %c0_i32 = arith.constant 0 : i32
    return %arg2, %arg1 : i32, i32
  }
  func.func @transform_2(%arg0: i32, %arg1: i32, %arg2: i32) -> (i32, i32) {
    %c0_i32 = arith.constant 0 : i32
    return %arg0, %arg1 : i32, i32
  }
}

</mosaic_0001>

<bundles_post_ra>
// kernel: pallas_matmul.1
= control target key start
LH: loop header
LB: loop body
LE: loop exit
PB: predicated region body
PF: predicated region fallthrough
CT: control target
= control target key end

     0   :  { %s2787_s9 = smov 0   ;;  %s2789_s10 = smov 0   ;;  %s3614_s0 = inlined_call_operand.vmem [shape: bf16[16384,48], index: 0, kind: input, shape index: {}]   ;;  %s3615_s1 = inlined_call_operand.vmem [shape: bf16[48,4], index: 1, kind: input, shape index: {}]   ;;  %s3616_s2 = inlined_call_operand.vmem [shape: f32[16384,4], index: 2, kind: output, shape index: {}]  }
   0x1   :  { %s2791_s11 = smov 0  }
   0x2 LB: > { %s31_s12 = sadd.s32 1, %s2765_s10  ;;  %p2310_p0 = scmp.ge.s32.totalorder %s2769_s11, 1  ;;  %s2769_s11 = sphi %s2791_s11, %s12_s11   ;;  %s2765_s10 = sphi %s2789_s10, %s3618_s10   ;;  %s2761_s9 = sphi %s2787_s9, %s3617_s9  }
   0x3   : > { %p33_p1 = scmp.ge.s32.totalorder %s31_s12, 16  ;;  %p155_p2 = scmp.lt.s32.totalorder %s2769_s11, 17 }
   0x5   : > { %s3620_s12 = smov (%p33_p1, %s31_s12), 0  ;;  %p156_p3 = pnand %p2310_p0, %p155_p2 }
   0x6   : > { %v2680_v0 = vld [vmem:[%s3615_s1] sm:$0xff] (!%p156_p3)   ;;  %s2311_s15 = sshll.u32 (!%p156_p3), %s2761_s9, 7  ;;  %v2681_v1 = vld [vmem:[%s3615_s1 + $0x8] sm:$0xff] (!%p156_p3)   ;;  %v2816_v2 = vld [vmem:[%s3615_s1 + $0x10] sm:$0xff] (!%p156_p3)   ;;  %vm952_vm0 = vcmask (!%p156_p3), 392192   ;;  %vm223_vm1 = vcmask (!%p156_p3), 31744  }
   0x7   : > { %159 = sbr.rel (%p156_p3) target bundleno = 370 (0x172), region = 28  ;;  %p192_p4 = scmp.lt.s32.totalorder (!%p156_p3), %s2311_s15, 2047  ;;  %2515 = vmatprep.subr.bf16.mxu0 (!%p156_p3), %v2680_v0  ;;  %2649 = vmatprep.subr.bf16.mxu1 (!%p156_p3), %v2680_v0  ;;  %v2771_v4 = vmov (!%p156_p3), 0.0  }
   0x8   : > { %2516 = vmatpush3.bf16.msra.mxu0 (!%p156_p3), %v2680_v0  ;;  %2652 = vmatpush3.bf16.msra.mxu1 (!%p156_p3), %v2680_v0  ;;  %226 = vst.msk [vmem:[#allocation2 + $0x10] sm:$0xff] (!%p156_p3), %vm223_vm1, %v2771_v4  ;;  %224 = vst.msk [vmem:[#allocation2] sm:$0xff] (!%p156_p3), %vm223_vm1, %v2771_v4 }
   0x9   : > { %2517 = vmatprep.subr.bf16.mxu0 (!%p156_p3), %v2681_v1  ;;  %2650 = vmatprep.subr.bf16.mxu1 (!%p156_p3), %v2681_v1  ;;  %225 = vst.msk [vmem:[#allocation2 + $0x8] sm:$0xff] (!%p156_p3), %vm223_vm1, %v2771_v4  ;;  %227 = vst.msk [vmem:[#allocation2 + $0x18] sm:$0xff] (!%p156_p3), %vm223_vm1, %v2771_v4 }
   0xa   : > { %228 = vst.msk [vmem:[#allocation2 + $0x20] sm:$0xff] (!%p156_p3), %vm223_vm1, %v2771_v4  ;;  %229 = vst.msk [vmem:[#allocation2 + $0x28] sm:$0xff] (!%p156_p3), %vm223_vm1, %v2771_v4 }
   0xb   : > { %230 = vst.msk [vmem:[#allocation2 + $0x30] sm:$0xff] (!%p156_p3), %vm223_vm1, %v2771_v4  ;;  %231 = vst.msk [vmem:[#allocation2 + $0x38] sm:$0xff] (!%p156_p3), %vm223_vm1, %v2771_v4 }
   0xc   : > { %2518 = vmatpush3.bf16.msra.mxu0 (!%p156_p3), %v2681_v1  ;;  %2653 = vmatpush3.bf16.msra.mxu1 (!%p156_p3), %v2681_v1  ;;  %232 = vst.msk [vmem:[#allocation2 + $0x40] sm:$0xff] (!%p156_p3), %vm223_vm1, %v2771_v4  ;;  %233 = vst.msk [vmem:[#allocation2 + $0x48] sm:$0xff] (!%p156_p3), %vm223_vm1, %v2771_v4 }
   0xd   : > { %234 = vst.msk [vmem:[#allocation2 + $0x50] sm:$0xff] (!%p156_p3), %vm223_vm1, %v2771_v4  ;;  %235 = vst.msk [vmem:[#allocation2 + $0x58] sm:$0xff] (!%p156_p3), %vm223_vm1, %v2771_v4  ;;  %2519 = vmatprep.subr.bf16.mxu0 (!%p156_p3), %v2816_v2  ;;  %2651 = vmatprep.subr.bf16.mxu1 (!%p156_p3), %v2816_v2 }
   0xe   : > { %s3622_s15 = smov (!%p192_p4, %s2311_s15), 2047  ;;  %236 = vst.msk [vmem:[#allocation2 + $0x60] sm:$0xff] %vm223_vm1, %v2771_v4  ;;  %237 = vst.msk [vmem:[#allocation2 + $0x68] sm:$0xff] %vm223_vm1, %v2771_v4 }
   0xf   : > { %s2312_s20 = sshll.u32 %s3622_s15, 2  ;;  %238 = vst.msk [vmem:[#allocation2 + $0x70] sm:$0xff] %vm223_vm1, %v2771_v4  ;;  %239 = vst.msk [vmem:[#allocation2 + $0x78] sm:$0xff] %vm223_vm1, %v2771_v4  ;;  %s2314_s24 = sshll.u32 %s3622_s15, 3 }
  0x10   : > { %s2822_s23 = scalar_lea.vmem %s3614_s0, %s2312_s20  ;;  %240 = vst.msk [vmem:[#allocation2 + $0x80] sm:$0xff] %vm223_vm1, %v2771_v4  ;;  %241 = vst.msk [vmem:[#allocation2 + $0x88] sm:$0xff] %vm223_vm1, %v2771_v4  ;;  %2520 = vmatpush3.bf16.msra.mxu0 %v2816_v2  ;;  %2654 = vmatpush3.bf16.msra.mxu1 %v2816_v2  ;;  %s3227_s27 = scalar_lea.vmem %s3616_s2, %s2314_s24 }
  0x11   : > { %v2825_v3 = vld [vmem:[%s2822_s23] sm:$0xff]   ;;  %242 = vst.msk [vmem:[#allocation2 + $0x90] sm:$0xff] %vm223_vm1, %v2771_v4  ;;  %243 = vst.msk [vmem:[#allocation2 + $0x98] sm:$0xff] %vm223_vm1, %v2771_v4  ;;  %v2685_v6 = vld [vmem:[%s2822_s23 + $0x8] sm:$0xff]  }
  0x12   : > { %244 = vst.msk [vmem:[#allocation2 + $0xa0] sm:$0xff] %vm223_vm1, %v2771_v4  ;;  %245 = vst.msk [vmem:[#allocation2 + $0xa8] sm:$0xff] %vm223_vm1, %v2771_v4  ;;  %v2684_v5 = vld [vmem:[%s2822_s23 + $0x100] sm:$0xff]   ;;  %2521 = vmatprep.mubr.msk.bf16.mxu0 %vm952_vm0, %v2825_v3  ;;  %v2686_v7 = vld [vmem:[%s2822_s23 + $0x108] sm:$0xff]  }
  0x13   : > { %246 = vst.msk [vmem:[#allocation2 + $0xb0] sm:$0xff] %vm223_vm1, %v2771_v4  ;;  %247 = vst.msk [vmem:[#allocation2 + $0xb8] sm:$0xff] %vm223_vm1, %v2771_v4  ;;  %2585 = vmatprep.mubr.msk.bf16.mxu1 %vm952_vm0, %v2684_v5  ;;  %v2687_v8 = vld [vmem:[%s2822_s23 + $0x10] sm:$0xff]   ;;  %2522 = vmatmul.mubr.msk.bf16.vlgmr.msra.gmra.mrb[0].mxu0 %vm952_vm0, %v2685_v6  ;;  %v2689_v10 = vld [vmem:[%s2822_s23 + $0x18] sm:$0xff]  }
  0x14   : > { %248 = vst.msk [vmem:[#allocation2 + $0xc0] sm:$0xff] %vm223_vm1, %v2771_v4  ;;  %249 = vst.msk [vmem:[#allocation2 + $0xc8] sm:$0xff] %vm223_vm1, %v2771_v4  ;;  %v2688_v9 = vld [vmem:[%s2822_s23 + $0x110] sm:$0xff]   ;;  %2586 = vmatmul.mubr.msk.bf16.vlgmr.msra.gmra.mrb[0].mxu1 %vm952_vm0, %v2686_v7  ;;  %2525 = vmatprep.mubr.msk.bf16.mxu0 %vm952_vm0, %v2687_v8  ;;  %v2690_v11 = vld [vmem:[%s2822_s23 + $0x118] sm:$0xff]  }
  0x15   : > { %250 = vst.msk [vmem:[#allocation2 + $0xd0] sm:$0xff] %vm223_vm1, %v2771_v4  ;;  %251 = vst.msk [vmem:[#allocation2 + $0xd8] sm:$0xff] %vm223_vm1, %v2771_v4  ;;  %2589 = vmatprep.mubr.msk.bf16.mxu1 %vm952_vm0, %v2688_v9  ;;  %v2691_v12 = vld [vmem:[%s2822_s23 + $0x20] sm:$0xff]   ;;  %v2693_v14 = vld [vmem:[%s2822_s23 + $0x28] sm:$0xff]  }
  0x16   : > { %252 = vst.msk [vmem:[#allocation2 + $0xe0] sm:$0xff] %vm223_vm1, %v2771_v4  ;;  %253 = vst.msk [vmem:[#allocation2 + $0xe8] sm:$0xff] %vm223_vm1, %v2771_v4  ;;  %v2692_v13 = vld [vmem:[%s2822_s23 + $0x120] sm:$0xff]   ;;  %v2694_v15 = vld [vmem:[%s2822_s23 + $0x128] sm:$0xff]  }
  0x17   : > { %254 = vst.msk [vmem:[#allocation2 + $0xf0] sm:$0xff] %vm223_vm1, %v2771_v4  ;;  %255 = vst.msk [vmem:[#allocation2 + $0xf8] sm:$0xff] %vm223_vm1, %v2771_v4  ;;  %v2695_v16 = vld [vmem:[%s2822_s23 + $0x30] sm:$0xff]   ;;  %v2697_v18 = vld [vmem:[%s2822_s23 + $0x38] sm:$0xff]  }
  0x18   : > { %256 = vst.msk [vmem:[#allocation2 + $0x100] sm:$0xff] %vm223_vm1, %v2771_v4  ;;  %257 = vst.msk [vmem:[#allocation2 + $0x108] sm:$0xff] %vm223_vm1, %v2771_v4  ;;  %v2696_v17 = vld [vmem:[%s2822_s23 + $0x130] sm:$0xff]   ;;  %v2698_v19 = vld [vmem:[%s2822_s23 + $0x138] sm:$0xff]  }
  0x19   : > { %258 = vst.msk [vmem:[#allocation2 + $0x110] sm:$0xff] %vm223_vm1, %v2771_v4  ;;  %259 = vst.msk [vmem:[#allocation2 + $0x118] sm:$0xff] %vm223_vm1, %v2771_v4  ;;  %v2699_v20 = vld [vmem:[%s2822_s23 + $0x40] sm:$0xff]   ;;  %v2701_v22 = vld [vmem:[%s2822_s23 + $0x48] sm:$0xff]  }
  0x1a   : > { %260 = vst.msk [vmem:[#allocation2 + $0x120] sm:$0xff] %vm223_vm1, %v2771_v4  ;;  %261 = vst.msk [vmem:[#allocation2 + $0x128] sm:$0xff] %vm223_vm1, %v2771_v4  ;;  %v2700_v21 = vld [vmem:[%s2822_s23 + $0x140] sm:$0xff]   ;;  %v2702_v23 = vld [vmem:[%s2822_s23 + $0x148] sm:$0xff]  }
  0x1b   : > { %262 = vst.msk [vmem:[#allocation2 + $0x130] sm:$0xff] %vm223_vm1, %v2771_v4  ;;  %263 = vst.msk [vmem:[#allocation2 + $0x138] sm:$0xff] %vm223_vm1, %v2771_v4  ;;  %2526 = vmatmul.mubr.msk.bf16.gmra.mrb[4].mxu0 %vm952_vm0, %v2689_v10  ;;  %v2703_v24 = vld [vmem:[%s2822_s23 + $0x50] sm:$0xff]   ;;  %v2705_v26 = vld [vmem:[%s2822_s23 + $0x58] sm:$0xff]  }
  0x1c   : > { %264 = vst.msk [vmem:[#allocation2 + $0x140] sm:$0xff] %vm223_vm1, %v2771_v4  ;;  %265 = vst.msk [vmem:[#allocation2 + $0x148] sm:$0xff] %vm223_vm1, %v2771_v4  ;;  %2590 = vmatmul.mubr.msk.bf16.gmra.mrb[4].mxu1 %vm952_vm0, %v2690_v11  ;;  %2529 = vmatprep.mubr.msk.bf16.mxu0 %vm952_vm0, %v2691_v12  ;;  %v2704_v25 = vld [vmem:[%s2822_s23 + $0x150] sm:$0xff]   ;;  %v2706_v27 = vld [vmem:[%s2822_s23 + $0x158] sm:$0xff]  }
  0x1d   : > { %266 = vst.msk [vmem:[#allocation2 + $0x150] sm:$0xff] %vm223_vm1, %v2771_v4  ;;  %267 = vst.msk [vmem:[#allocation2 + $0x158] sm:$0xff] %vm223_vm1, %v2771_v4  ;;  %2593 = vmatprep.mubr.msk.bf16.mxu1 %vm952_vm0, %v2692_v13  ;;  %v2707_v28 = vld [vmem:[%s2822_s23 + $0x60] sm:$0xff]   ;;  %v2709_v30 = vld [vmem:[%s2822_s23 + $0x68] sm:$0xff]  }
  0x1e   : > { %268 = vst.msk [vmem:[#allocation2 + $0x160] sm:$0xff] %vm223_vm1, %v2771_v4  ;;  %269 = vst.msk [vmem:[#allocation2 + $0x168] sm:$0xff] %vm223_vm1, %v2771_v4  ;;  %v2708_v29 = vld [vmem:[%s2822_s23 + $0x160] sm:$0xff]   ;;  %v2710_v31 = vld [vmem:[%s2822_s23 + $0x168] sm:$0xff]  }
  0x1f   : > { %270 = vst.msk [vmem:[#allocation2 + $0x170] sm:$0xff] %vm223_vm1, %v2771_v4  ;;  %271 = vst.msk [vmem:[#allocation2 + $0x178] sm:$0xff] %vm223_vm1, %v2771_v4  ;;  %v2711_v32 = vld [vmem:[%s2822_s23 + $0x70] sm:$0xff]   ;;  %v2713_v34 = vld [vmem:[%s2822_s23 + $0x78] sm:$0xff]  }
  0x20   : > { %272 = vst.msk [vmem:[#allocation2 + $0x180] sm:$0xff] %vm223_vm1, %v2771_v4  ;;  %273 = vst.msk [vmem:[#allocation2 + $0x188] sm:$0xff] %vm223_vm1, %v2771_v4  ;;  %v2712_v33 = vld [vmem:[%s2822_s23 + $0x170] sm:$0xff]   ;;  %v2714_v35 = vld [vmem:[%s2822_s23 + $0x178] sm:$0xff]  }
  0x21   : > { %274 = vst.msk [vmem:[#allocation2 + $0x190] sm:$0xff] %vm223_vm1, %v2771_v4  ;;  %275 = vst.msk [vmem:[#allocation2 + $0x198] sm:$0xff] %vm223_vm1, %v2771_v4  ;;  %v2715_v36 = vld [vmem:[%s2822_s23 + $0x80] sm:$0xff]   ;;  %v2717_v38 = vld [vmem:[%s2822_s23 + $0x88] sm:$0xff]  }
  0x22   : > { %276 = vst.msk [vmem:[#allocation2 + $0x1a0] sm:$0xff] %vm223_vm1, %v2771_v4  ;;  %277 = vst.msk [vmem:[#allocation2 + $0x1a8] sm:$0xff] %vm223_vm1, %v2771_v4  ;;  %v2716_v37 = vld [vmem:[%s2822_s23 + $0x180] sm:$0xff]   ;;  %v2718_v39 = vld [vmem:[%s2822_s23 + $0x188] sm:$0xff]  }
  0x23   : > { %278 = vst.msk [vmem:[#allocation2 + $0x1b0] sm:$0xff] %vm223_vm1, %v2771_v4  ;;  %279 = vst.msk [vmem:[#allocation2 + $0x1b8] sm:$0xff] %vm223_vm1, %v2771_v4  ;;  %2530 = vmatmul.mubr.msk.bf16.gmra.mrb[8].mxu0 %vm952_vm0, %v2693_v14  ;;  %v2719_v40 = vld [vmem:[%s2822_s23 + $0x90] sm:$0xff]   ;;  %v2721_v42 = vld [vmem:[%s2822_s23 + $0x98] sm:$0xff]  }
  0x24   : > { %280 = vst.msk [vmem:[#allocation2 + $0x1c0] sm:$0xff] %vm223_vm1, %v2771_v4  ;;  %281 = vst.msk [vmem:[#allocation2 + $0x1c8] sm:$0xff] %vm223_vm1, %v2771_v4  ;;  %2594 = vmatmul.mubr.msk.bf16.gmra.mrb[8].mxu1 %vm952_vm0, %v2694_v15  ;;  %2533 = vmatprep.mubr.msk.bf16.mxu0 %vm952_vm0, %v2695_v16  ;;  %v2720_v41 = vld [vmem:[%s2822_s23 + $0x190] sm:$0xff]   ;;  %v2722_v43 = vld [vmem:[%s2822_s23 + $0x198] sm:$0xff]  }
  0x25   : > { %282 = vst.msk [vmem:[#allocation2 + $0x1d0] sm:$0xff] %vm223_vm1, %v2771_v4  ;;  %283 = vst.msk [vmem:[#allocation2 + $0x1d8] sm:$0xff] %vm223_vm1, %v2771_v4  ;;  %2597 = vmatprep.mubr.msk.bf16.mxu1 %vm952_vm0, %v2696_v17  ;;  %v2723_v44 = vld [vmem:[%s2822_s23 + $0xa0] sm:$0xff]   ;;  %v2725_v46 = vld [vmem:[%s2822_s23 + $0xa8] sm:$0xff]  }
  0x26   : > { %284 = vst.msk [vmem:[#allocation2 + $0x1e0] sm:$0xff] %vm223_vm1, %v2771_v4  ;;  %285 = vst.msk [vmem:[#allocation2 + $0x1e8] sm:$0xff] %vm223_vm1, %v2771_v4  ;;  %v2724_v45 = vld [vmem:[%s2822_s23 + $0x1a0] sm:$0xff]   ;;  %v2726_v47 = vld [vmem:[%s2822_s23 + $0x1a8] sm:$0xff]  }
  0x27   : > { %286 = vst.msk [vmem:[#allocation2 + $0x1f0] sm:$0xff] %vm223_vm1, %v2771_v4  ;;  %287 = vst.msk [vmem:[#allocation2 + $0x1f8] sm:$0xff] %vm223_vm1, %v2771_v4  ;;  %v2727_v48 = vld [vmem:[%s2822_s23 + $0xb0] sm:$0xff]   ;;  %v2729_v50 = vld [vmem:[%s2822_s23 + $0xb8] sm:$0xff]  }
  0x28   : > { %288 = vst.msk [vmem:[#allocation2 + $0x200] sm:$0xff] %vm223_vm1, %v2771_v4  ;;  %289 = vst.msk [vmem:[#allocation2 + $0x208] sm:$0xff] %vm223_vm1, %v2771_v4  ;;  %v2728_v49 = vld [vmem:[%s2822_s23 + $0x1b0] sm:$0xff]   ;;  %v2730_v51 = vld [vmem:[%s2822_s23 + $0x1b8] sm:$0xff]  }
  0x29   : > { %290 = vst.msk [vmem:[#allocation2 + $0x210] sm:$0xff] %vm223_vm1, %v2771_v4  ;;  %291 = vst.msk [vmem:[#allocation2 + $0x218] sm:$0xff] %vm223_vm1, %v2771_v4  ;;  %v2731_v52 = vld [vmem:[%s2822_s23 + $0xc0] sm:$0xff]   ;;  %v2733_v54 = vld [vmem:[%s2822_s23 + $0xc8] sm:$0xff]  }
  0x2a   : > { %292 = vst.msk [vmem:[#allocation2 + $0x220] sm:$0xff] %vm223_vm1, %v2771_v4  ;;  %293 = vst.msk [vmem:[#allocation2 + $0x228] sm:$0xff] %vm223_vm1, %v2771_v4  ;;  %v2732_v53 = vld [vmem:[%s2822_s23 + $0x1c0] sm:$0xff]   ;;  %v2734_v55 = vld [vmem:[%s2822_s23 + $0x1c8] sm:$0xff]  }
  0x2b   : > { %294 = vst.msk [vmem:[#allocation2 + $0x230] sm:$0xff] %vm223_vm1, %v2771_v4  ;;  %295 = vst.msk [vmem:[#allocation2 + $0x238] sm:$0xff] %vm223_vm1, %v2771_v4  ;;  %2534 = vmatmul.mubr.msk.bf16.gmra.mrb[12].mxu0 %vm952_vm0, %v2697_v18  ;;  %v2735_v56 = vld [vmem:[%s2822_s23 + $0xd0] sm:$0xff]   ;;  %v2737_v58 = vld [vmem:[%s2822_s23 + $0xd8] sm:$0xff]  }
  0x2c   : > { %296 = vst.msk [vmem:[#allocation2 + $0x240] sm:$0xff] %vm223_vm1, %v2771_v4  ;;  %297 = vst.msk [vmem:[#allocation2 + $0x248] sm:$0xff] %vm223_vm1, %v2771_v4  ;;  %2598 = vmatmul.mubr.msk.bf16.gmra.mrb[12].mxu1 %vm952_vm0, %v2698_v19  ;;  %2537 = vmatprep.mubr.msk.bf16.mxu0 %vm952_vm0, %v2699_v20  ;;  %v2736_v57 = vld [vmem:[%s2822_s23 + $0x1d0] sm:$0xff]   ;;  %v2738_v59 = vld [vmem:[%s2822_s23 + $0x1d8] sm:$0xff]  }
  0x2d   : > { %298 = vst.msk [vmem:[#allocation2 + $0x250] sm:$0xff] %vm223_vm1, %v2771_v4  ;;  %299 = vst.msk [vmem:[#allocation2 + $0x258] sm:$0xff] %vm223_vm1, %v2771_v4  ;;  %2601 = vmatprep.mubr.msk.bf16.mxu1 %vm952_vm0, %v2700_v21  ;;  %v2739_v60 = vld [vmem:[%s2822_s23 + $0xe0] sm:$0xff]   ;;  %v2741_v62 = vld [vmem:[%s2822_s23 + $0xe8] sm:$0xff]  }
  0x2e   : > { %300 = vst.msk [vmem:[#allocation2 + $0x260] sm:$0xff] %vm223_vm1, %v2771_v4  ;;  %301 = vst.msk [vmem:[#allocation2 + $0x268] sm:$0xff] %vm223_vm1, %v2771_v4  ;;  %v2740_v61 = vld [vmem:[%s2822_s23 + $0x1e0] sm:$0xff]   ;;  %v2742_v63 = vld [vmem:[%s2822_s23 + $0x1e8] sm:$0xff]  }
  0x2f   : > { %302 = vst.msk [vmem:[#allocation2 + $0x270] sm:$0xff] %vm223_vm1, %v2771_v4  ;;  %303 = vst.msk [vmem:[#allocation2 + $0x278] sm:$0xff] %vm223_vm1, %v2771_v4  ;;  %v2743_v0 = vld [vmem:[%s2822_s23 + $0xf0] sm:$0xff]   ;;  %v2745_v2 = vld [vmem:[%s2822_s23 + $0xf8] sm:$0xff]  }
  0x30   : > { %304 = vst.msk [vmem:[#allocation2 + $0x280] sm:$0xff] %vm223_vm1, %v2771_v4  ;;  %305 = vst.msk [vmem:[#allocation2 + $0x288] sm:$0xff] %vm223_vm1, %v2771_v4  ;;  %v2744_v1 = vld [vmem:[%s2822_s23 + $0x1f0] sm:$0xff]   ;;  %v2746_v3 = vld [vmem:[%s2822_s23 + $0x1f8] sm:$0xff]  }
  0x31   : > { %306 = vst.msk [vmem:[#allocation2 + $0x290] sm:$0xff] %vm223_vm1, %v2771_v4  ;;  %307 = vst.msk [vmem:[#allocation2 + $0x298] sm:$0xff] %vm223_vm1, %v2771_v4  ;;  %v418_v5 = vld [vmem:[#allocation2 + $0x210] sm:$0xff]  ;;  %v352_v6 = vld [vmem:[#allocation2] sm:$0xff] }
  0x32   : > { %308 = vst.msk [vmem:[#allocation2 + $0x2a0] sm:$0xff] %vm223_vm1, %v2771_v4  ;;  %309 = vst.msk [vmem:[#allocation2 + $0x2a8] sm:$0xff] %vm223_vm1, %v2771_v4  ;;  %v416_v7 = vld [vmem:[#allocation2 + $0x200] sm:$0xff]  ;;  %v355_v10 = vld [vmem:[#allocation2 + $0x18] sm:$0xff] }
  0x33   : > { %310 = vst.msk [vmem:[#allocation2 + $0x2b0] sm:$0xff] %vm223_vm1, %v2771_v4  ;;  %311 = vst.msk [vmem:[#allocation2 + $0x2b8] sm:$0xff] %vm223_vm1, %v2771_v4  ;;  %2538 = vmatmul.mubr.msk.bf16.gmra.mrb[16].mxu0 %vm952_vm0, %v2701_v22  ;;  %v419_v11 = vld [vmem:[#allocation2 + $0x218] sm:$0xff]  ;;  %v353_v16 = vld [vmem:[#allocation2 + $0x8] sm:$0xff] }
  0x34   : > { %312 = vst.msk [vmem:[#allocation2 + $0x2c0] sm:$0xff] %vm223_vm1, %v2771_v4  ;;  %313 = vst.msk [vmem:[#allocation2 + $0x2c8] sm:$0xff] %vm223_vm1, %v2771_v4  ;;  %2602 = vmatmul.mubr.msk.bf16.gmra.mrb[16].mxu1 %vm952_vm0, %v2702_v23  ;;  %2541 = vmatprep.mubr.msk.bf16.mxu0 %vm952_vm0, %v2703_v24  ;;  %v417_v17 = vld [vmem:[#allocation2 + $0x208] sm:$0xff] }
  0x35   : > { %314 = vst.msk [vmem:[#allocation2 + $0x2d0] sm:$0xff] %vm223_vm1, %v2771_v4  ;;  %315 = vst.msk [vmem:[#allocation2 + $0x2d8] sm:$0xff] %vm223_vm1, %v2771_v4  ;;  %2605 = vmatprep.mubr.msk.bf16.mxu1 %vm952_vm0, %v2704_v25 }
  0x36   : > { %316 = vst.msk [vmem:[#allocation2 + $0x2e0] sm:$0xff] %vm223_vm1, %v2771_v4  ;;  %317 = vst.msk [vmem:[#allocation2 + $0x2e8] sm:$0xff] %vm223_vm1, %v2771_v4 }
  0x37   : > { %318 = vst.msk [vmem:[#allocation2 + $0x2f0] sm:$0xff] %vm223_vm1, %v2771_v4  ;;  %319 = vst.msk [vmem:[#allocation2 + $0x2f8] sm:$0xff] %vm223_vm1, %v2771_v4 }
  0x38   : > { %320 = vst.msk [vmem:[#allocation2 + $0x300] sm:$0xff] %vm223_vm1, %v2771_v4  ;;  %321 = vst.msk [vmem:[#allocation2 + $0x308] sm:$0xff] %vm223_vm1, %v2771_v4 }
  0x39   : > { %322 = vst.msk [vmem:[#allocation2 + $0x310] sm:$0xff] %vm223_vm1, %v2771_v4  ;;  %323 = vst.msk [vmem:[#allocation2 + $0x318] sm:$0xff] %vm223_vm1, %v2771_v4 }
  0x3a   : > { %324 = vst.msk [vmem:[#allocation2 + $0x320] sm:$0xff] %vm223_vm1, %v2771_v4  ;;  %325 = vst.msk [vmem:[#allocation2 + $0x328] sm:$0xff] %vm223_vm1, %v2771_v4 }
  0x3b   : > { %326 = vst.msk [vmem:[#allocation2 + $0x330] sm:$0xff] %vm223_vm1, %v2771_v4  ;;  %327 = vst.msk [vmem:[#allocation2 + $0x338] sm:$0xff] %vm223_vm1, %v2771_v4  ;;  %2542 = vmatmul.mubr.msk.bf16.gmra.mrb[20].mxu0 %vm952_vm0, %v2705_v26 }
  0x3c   : > { %328 = vst.msk [vmem:[#allocation2 + $0x340] sm:$0xff] %vm223_vm1, %v2771_v4  ;;  %329 = vst.msk [vmem:[#allocation2 + $0x348] sm:$0xff] %vm223_vm1, %v2771_v4  ;;  %2606 = vmatmul.mubr.msk.bf16.gmra.mrb[20].mxu1 %vm952_vm0, %v2706_v27  ;;  %2545 = vmatprep.mubr.msk.bf16.mxu0 %vm952_vm0, %v2707_v28  ;;  %v358_v28 = vld [vmem:[#allocation2 + $0x30] sm:$0xff] }
  0x3d   : > { %330 = vst.msk [vmem:[#allocation2 + $0x350] sm:$0xff] %vm223_vm1, %v2771_v4  ;;  %331 = vst.msk [vmem:[#allocation2 + $0x358] sm:$0xff] %vm223_vm1, %v2771_v4  ;;  %2609 = vmatprep.mubr.msk.bf16.mxu1 %vm952_vm0, %v2708_v29  ;;  %v422_v29 = vld [vmem:[#allocation2 + $0x230] sm:$0xff] }
  0x3e   : > { %332 = vst.msk [vmem:[#allocation2 + $0x360] sm:$0xff] %vm223_vm1, %v2771_v4  ;;  %333 = vst.msk [vmem:[#allocation2 + $0x368] sm:$0xff] %vm223_vm1, %v2771_v4 }
  0x3f   : > { %334 = vst.msk [vmem:[#allocation2 + $0x370] sm:$0xff] %vm223_vm1, %v2771_v4  ;;  %335 = vst.msk [vmem:[#allocation2 + $0x378] sm:$0xff] %vm223_vm1, %v2771_v4 }
  0x40   : > { %336 = vst.msk [vmem:[#allocation2 + $0x380] sm:$0xff] %vm223_vm1, %v2771_v4  ;;  %337 = vst.msk [vmem:[#allocation2 + $0x388] sm:$0xff] %vm223_vm1, %v2771_v4 }
  0x41   : > { %338 = vst.msk [vmem:[#allocation2 + $0x390] sm:$0xff] %vm223_vm1, %v2771_v4  ;;  %339 = vst.msk [vmem:[#allocation2 + $0x398] sm:$0xff] %vm223_vm1, %v2771_v4 }
  0x42   : > { %340 = vst.msk [vmem:[#allocation2 + $0x3a0] sm:$0xff] %vm223_vm1, %v2771_v4  ;;  %341 = vst.msk [vmem:[#allocation2 + $0x3a8] sm:$0xff] %vm223_vm1, %v2771_v4 }
  0x43   : > { %342 = vst.msk [vmem:[#allocation2 + $0x3b0] sm:$0xff] %vm223_vm1, %v2771_v4  ;;  %343 = vst.msk [vmem:[#allocation2 + $0x3b8] sm:$0xff] %vm223_vm1, %v2771_v4  ;;  %2546 = vmatmul.mubr.msk.bf16.gmra.mrb[24].mxu0 %vm952_vm0, %v2709_v30  ;;  %v356_v30 = vld [vmem:[#allocation2 + $0x20] sm:$0xff] }
  0x44   : > { %344 = vst.msk [vmem:[#allocation2 + $0x3c0] sm:$0xff] %vm223_vm1, %v2771_v4  ;;  %345 = vst.msk [vmem:[#allocation2 + $0x3c8] sm:$0xff] %vm223_vm1, %v2771_v4  ;;  %2610 = vmatmul.mubr.msk.bf16.gmra.mrb[24].mxu1 %vm952_vm0, %v2710_v31  ;;  %2549 = vmatprep.mubr.msk.bf16.mxu0 %vm952_vm0, %v2711_v32  ;;  %v420_v31 = vld [vmem:[#allocation2 + $0x220] sm:$0xff] }
  0x45   : > { %346 = vst.msk [vmem:[#allocation2 + $0x3d0] sm:$0xff] %vm223_vm1, %v2771_v4  ;;  %347 = vst.msk [vmem:[#allocation2 + $0x3d8] sm:$0xff] %vm223_vm1, %v2771_v4  ;;  %2613 = vmatprep.mubr.msk.bf16.mxu1 %vm952_vm0, %v2712_v33 }
  0x46   : > { %348 = vst.msk [vmem:[#allocation2 + $0x3e0] sm:$0xff] %vm223_vm1, %v2771_v4  ;;  %349 = vst.msk [vmem:[#allocation2 + $0x3e8] sm:$0xff] %vm223_vm1, %v2771_v4 }
  0x47   : > { %350 = vst.msk [vmem:[#allocation2 + $0x3f0] sm:$0xff] %vm223_vm1, %v2771_v4  ;;  %351 = vst.msk [vmem:[#allocation2 + $0x3f8] sm:$0xff] %vm223_vm1, %v2771_v4  ;;  %v354_v4 = vld [vmem:[#allocation2 + $0x10] sm:$0xff] }
  0x4b   : > { %2550 = vmatmul.mubr.msk.bf16.gmra.mrb[28].mxu0 %vm952_vm0, %v2713_v34  ;;  %v359_v34 = vld [vmem:[#allocation2 + $0x38] sm:$0xff] }
  0x4c   : > { %2614 = vmatmul.mubr.msk.bf16.gmra.mrb[28].mxu1 %vm952_vm0, %v2714_v35  ;;  %2553 = vmatprep.mubr.msk.bf16.mxu0 %vm952_vm0, %v2715_v36  ;;  %v423_v35 = vld [vmem:[#allocation2 + $0x238] sm:$0xff] }
  0x4d   : > { %2617 = vmatprep.mubr.msk.bf16.mxu1 %vm952_vm0, %v2716_v37 }
  0x53   : > { %2554 = vmatmul.mubr.msk.bf16.gmra.mrb[32].mxu0 %vm952_vm0, %v2717_v38 }
  0x54   : > { %2618 = vmatmul.mubr.msk.bf16.gmra.mrb[32].mxu1 %vm952_vm0, %v2718_v39  ;;  %2557 = vmatprep.mubr.msk.bf16.mxu0 %vm952_vm0, %v2719_v40  ;;  %v357_v40 = vld [vmem:[#allocation2 + $0x28] sm:$0xff] }
  0x55   : > { %2621 = vmatprep.mubr.msk.bf16.mxu1 %vm952_vm0, %v2720_v41  ;;  %v421_v41 = vld [vmem:[#allocation2 + $0x228] sm:$0xff] }
  0x5b   : > { %2558 = vmatmul.mubr.msk.bf16.gmra.mrb[36].mxu0 %vm952_vm0, %v2721_v42 }
  0x5c   : > { %2622 = vmatmul.mubr.msk.bf16.gmra.mrb[36].mxu1 %vm952_vm0, %v2722_v43  ;;  %2561 = vmatprep.mubr.msk.bf16.mxu0 %vm952_vm0, %v2723_v44 }
  0x5d   : > { %2625 = vmatprep.mubr.msk.bf16.mxu1 %vm952_vm0, %v2724_v45 }
  0x63   : > { %2562 = vmatmul.mubr.msk.bf16.gmra.mrb[40].mxu0 %vm952_vm0, %v2725_v46 }
  0x64   : > { %2626 = vmatmul.mubr.msk.bf16.gmra.mrb[40].mxu1 %vm952_vm0, %v2726_v47  ;;  %2565 = vmatprep.mubr.msk.bf16.mxu0 %vm952_vm0, %v2727_v48 }
  0x65   : > { %2629 = vmatprep.mubr.msk.bf16.mxu1 %vm952_vm0, %v2728_v49 }
  0x6b   : > { %2566 = vmatmul.mubr.msk.bf16.gmra.mrb[44].mxu0 %vm952_vm0, %v2729_v50 }
  0x6c   : > { %2630 = vmatmul.mubr.msk.bf16.gmra.mrb[44].mxu1 %vm952_vm0, %v2730_v51  ;;  %2569 = vmatprep.mubr.msk.bf16.mxu0 %vm952_vm0, %v2731_v52 }
  0x6d   : > { %2633 = vmatprep.mubr.msk.bf16.mxu1 %vm952_vm0, %v2732_v53 }
  0x73   : > { %2570 = vmatmul.mubr.msk.bf16.gmra.mrb[48].mxu0 %vm952_vm0, %v2733_v54 }
  0x74   : > { %2634 = vmatmul.mubr.msk.bf16.gmra.mrb[48].mxu1 %vm952_vm0, %v2734_v55  ;;  %2573 = vmatprep.mubr.msk.bf16.mxu0 %vm952_vm0, %v2735_v56 }
  0x75   : > { %2637 = vmatprep.mubr.msk.bf16.mxu1 %vm952_vm0, %v2736_v57 }
  0x7b   : > { %2574 = vmatmul.mubr.msk.bf16.gmra.mrb[52].mxu0 %vm952_vm0, %v2737_v58 }
  0x7c   : > { %2638 = vmatmul.mubr.msk.bf16.gmra.mrb[52].mxu1 %vm952_vm0, %v2738_v59  ;;  %2577 = vmatprep.mubr.msk.bf16.mxu0 %vm952_vm0, %v2739_v60  ;;  %v362_v60 = vld [vmem:[#allocation2 + $0x50] sm:$0xff] }
  0x7d   : > { %2641 = vmatprep.mubr.msk.bf16.mxu1 %vm952_vm0, %v2740_v61  ;;  %v426_v61 = vld [vmem:[#allocation2 + $0x250] sm:$0xff] }
  0x83   : > { %2578 = vmatmul.mubr.msk.bf16.gmra.mrb[56].mxu0 %vm952_vm0, %v2741_v62  ;;  %v360_v62 = vld [vmem:[#allocation2 + $0x40] sm:$0xff] }
  0x84   : > { %2642 = vmatmul.mubr.msk.bf16.gmra.mrb[56].mxu1 %vm952_vm0, %v2742_v63  ;;  %2581 = vmatprep.mubr.msk.bf16.mxu0 %vm952_vm0, %v2743_v0  ;;  %v424_v63 = vld [vmem:[#allocation2 + $0x240] sm:$0xff] }
  0x85   : > { %2645 = vmatprep.mubr.msk.bf16.mxu1 %vm952_vm0, %v2744_v1 }
  0x8b   : > { %2582 = vmatmul.mubr.msk.bf16.gmra.mrb[60].mxu0 %vm952_vm0, %v2745_v2  ;;  %v363_v2 = vld [vmem:[#allocation2 + $0x58] sm:$0xff] }
  0x8c   : > { %2646 = vmatmul.mubr.msk.bf16.gmra.mrb[60].mxu1 %vm952_vm0, %v2746_v3  ;;  %v427_v3 = vld [vmem:[#allocation2 + $0x258] sm:$0xff] }
  0xe6   : > { %v2523_v8 = vpop.f32.mrb[0].mxu0 }
  0xe7   : > { %v2587_v9 = vpop.f32.mrb[0].mxu1  ;;  %v1692_v12 = vadd.f32 %v2523_v8, %v354_v4  ;;  %v1179_v14 = vpop.f32.mrb[1].mxu0  ;;  %v361_v8 = vld [vmem:[#allocation2 + $0x48] sm:$0xff] }
  0xe8   : > { %v1756_v13 = vadd.f32 %v2587_v9, %v418_v5  ;;  %v1435_v15 = vpop.f32.mrb[1].mxu1  ;;  %v1690_v18 = vadd.f32 %v1179_v14, %v352_v6  ;;  %v2524_v20 = vpop.f32.mrb[2].mxu0  ;;  %v425_v9 = vld [vmem:[#allocation2 + $0x248] sm:$0xff] }
  0xe9   : > { %v1754_v19 = vadd.f32 %v1435_v15, %v416_v7  ;;  %v2588_v21 = vpop.f32.mrb[2].mxu1  ;;  %1821 = vst.msk [vmem:[#allocation2 + $0x10] sm:$0xff] %vm223_vm1, %v1692_v12  ;;  %v1693_v22 = vadd.f32 %v2524_v20, %v355_v10  ;;  %v1182_v24 = vpop.f32.mrb[3].mxu0 }
  0xea   : > { %1885 = vst.msk [vmem:[#allocation2 + $0x210] sm:$0xff] %vm223_vm1, %v1756_v13  ;;  %v1757_v23 = vadd.f32 %v2588_v21, %v419_v11  ;;  %v1438_v25 = vpop.f32.mrb[3].mxu1  ;;  %1819 = vst.msk [vmem:[#allocation2] sm:$0xff] %vm223_vm1, %v1690_v18  ;;  %v1691_v26 = vadd.f32 %v1182_v24, %v353_v16 }
  0xeb   : > { %1883 = vst.msk [vmem:[#allocation2 + $0x200] sm:$0xff] %vm223_vm1, %v1754_v19  ;;  %v1755_v27 = vadd.f32 %v1438_v25, %v417_v17  ;;  %1822 = vst.msk [vmem:[#allocation2 + $0x18] sm:$0xff] %vm223_vm1, %v1693_v22 }
  0xec   : > { %1886 = vst.msk [vmem:[#allocation2 + $0x218] sm:$0xff] %vm223_vm1, %v1757_v23  ;;  %1820 = vst.msk [vmem:[#allocation2 + $0x8] sm:$0xff] %vm223_vm1, %v1691_v26 }
  0xed   : > { %1884 = vst.msk [vmem:[#allocation2 + $0x208] sm:$0xff] %vm223_vm1, %v1755_v27 }
  0xee   : > { %v2527_v32 = vpop.f32.mrb[4].mxu0 }
  0xef   : > { %v2591_v33 = vpop.f32.mrb[4].mxu1  ;;  %v1696_v36 = vadd.f32 %v2527_v32, %v358_v28  ;;  %v1195_v38 = vpop.f32.mrb[5].mxu0  ;;  %v366_v28 = vld [vmem:[#allocation2 + $0x70] sm:$0xff] }
  0xf0   : > { %v1760_v37 = vadd.f32 %v2591_v33, %v422_v29  ;;  %v1451_v39 = vpop.f32.mrb[5].mxu1  ;;  %v1952_v42 = vld [vmem:[#allocation2 + $0x10] sm:$0xff]  ;;  %v1694_v44 = vadd.f32 %v1195_v38, %v356_v30  ;;  %v2528_v46 = vpop.f32.mrb[6].mxu0  ;;  %v364_v30 = vld [vmem:[#allocation2 + $0x60] sm:$0xff] }
  0xf1   : > { %v2016_v43 = vld [vmem:[#allocation2 + $0x210] sm:$0xff]  ;;  %v1758_v45 = vadd.f32 %v1451_v39, %v420_v31  ;;  %v2592_v47 = vpop.f32.mrb[6].mxu1  ;;  %2080 = vst.msk [vmem:[%s3227_s27 + $0x10] sm:$0xff] %vm223_vm1, %v1952_v42  ;;  %v1950_v48 = vld [vmem:[#allocation2] sm:$0xff]  ;;  %1825 = vst.msk [vmem:[#allocation2 + $0x30] sm:$0xff] %vm223_vm1, %v1696_v36  ;;  %v1697_v50 = vadd.f32 %v2528_v46, %v359_v34  ;;  %v1198_v52 = vpop.f32.mrb[7].mxu0 }
  0xf2   : > { %2144 = vst.msk [vmem:[%s3227_s27 + $0x210] sm:$0xff] %vm223_vm1, %v2016_v43  ;;  %v2014_v49 = vld [vmem:[#allocation2 + $0x200] sm:$0xff]  ;;  %1889 = vst.msk [vmem:[#allocation2 + $0x230] sm:$0xff] %vm223_vm1, %v1760_v37  ;;  %v1761_v51 = vadd.f32 %v2592_v47, %v423_v35  ;;  %v1454_v53 = vpop.f32.mrb[7].mxu1  ;;  %v1953_v54 = vld [vmem:[#allocation2 + $0x18] sm:$0xff]  ;;  %v1695_v56 = vadd.f32 %v1198_v52, %v357_v40 }
  0xf3   : > { %2078 = vst.msk [vmem:[%s3227_s27] sm:$0xff] %vm223_vm1, %v1950_v48  ;;  %2142 = vst.msk [vmem:[%s3227_s27 + $0x200] sm:$0xff] %vm223_vm1, %v2014_v49  ;;  %v2017_v55 = vld [vmem:[#allocation2 + $0x218] sm:$0xff]  ;;  %v1759_v57 = vadd.f32 %v1454_v53, %v421_v41  ;;  %v1951_v58 = vld [vmem:[#allocation2 + $0x8] sm:$0xff] }
  0xf4   : > { %1823 = vst.msk [vmem:[#allocation2 + $0x20] sm:$0xff] %vm223_vm1, %v1694_v44  ;;  %1887 = vst.msk [vmem:[#allocation2 + $0x220] sm:$0xff] %vm223_vm1, %v1758_v45  ;;  %v2015_v59 = vld [vmem:[#allocation2 + $0x208] sm:$0xff]  ;;  %v430_v29 = vld [vmem:[#allocation2 + $0x270] sm:$0xff] }
  0xf5   : > { %2081 = vst.msk [vmem:[%s3227_s27 + $0x18] sm:$0xff] %vm223_vm1, %v1953_v54  ;;  %2145 = vst.msk [vmem:[%s3227_s27 + $0x218] sm:$0xff] %vm223_vm1, %v2017_v55  ;;  %v428_v31 = vld [vmem:[#allocation2 + $0x260] sm:$0xff]  ;;  %v367_v34 = vld [vmem:[#allocation2 + $0x78] sm:$0xff] }
  0xf6   : > { %1826 = vst.msk [vmem:[#allocation2 + $0x38] sm:$0xff] %vm223_vm1, %v1697_v50  ;;  %1890 = vst.msk [vmem:[#allocation2 + $0x238] sm:$0xff] %vm223_vm1, %v1761_v51  ;;  %v2531_v0 = vpop.f32.mrb[8].mxu0  ;;  %v431_v35 = vld [vmem:[#allocation2 + $0x278] sm:$0xff]  ;;  %v365_v40 = vld [vmem:[#allocation2 + $0x68] sm:$0xff] }
  0xf7   : > { %2079 = vst.msk [vmem:[%s3227_s27 + $0x8] sm:$0xff] %vm223_vm1, %v1951_v58  ;;  %2143 = vst.msk [vmem:[%s3227_s27 + $0x208] sm:$0xff] %vm223_vm1, %v2015_v59  ;;  %v2595_v1 = vpop.f32.mrb[8].mxu1  ;;  %v1700_v4 = vadd.f32 %v2531_v0, %v362_v60  ;;  %v1211_v6 = vpop.f32.mrb[9].mxu0  ;;  %v429_v41 = vld [vmem:[#allocation2 + $0x268] sm:$0xff]  ;;  %v370_v60 = vld [vmem:[#allocation2 + $0x90] sm:$0xff] }
  0xf8   : > { %1824 = vst.msk [vmem:[#allocation2 + $0x28] sm:$0xff] %vm223_vm1, %v1695_v56  ;;  %1888 = vst.msk [vmem:[#allocation2 + $0x228] sm:$0xff] %vm223_vm1, %v1759_v57  ;;  %v1764_v5 = vadd.f32 %v2595_v1, %v426_v61  ;;  %v1467_v7 = vpop.f32.mrb[9].mxu1  ;;  %v1956_v10 = vld [vmem:[#allocation2 + $0x30] sm:$0xff]  ;;  %v1698_v12 = vadd.f32 %v1211_v6, %v360_v62  ;;  %v2532_v14 = vpop.f32.mrb[10].mxu0  ;;  %v368_v62 = vld [vmem:[#allocation2 + $0x80] sm:$0xff] }
  0xf9   : > { %v2020_v11 = vld [vmem:[#allocation2 + $0x230] sm:$0xff]  ;;  %v1762_v13 = vadd.f32 %v1467_v7, %v424_v63  ;;  %v2596_v15 = vpop.f32.mrb[10].mxu1  ;;  %2084 = vst.msk [vmem:[%s3227_s27 + $0x30] sm:$0xff] %vm223_vm1, %v1956_v10  ;;  %1829 = vst.msk [vmem:[#allocation2 + $0x50] sm:$0xff] %vm223_vm1, %v1700_v4  ;;  %v1701_v18 = vadd.f32 %v2532_v14, %v363_v2  ;;  %v1214_v20 = vpop.f32.mrb[11].mxu0  ;;  %v432_v63 = vld [vmem:[#allocation2 + $0x280] sm:$0xff] }
  0xfa   : > { %2148 = vst.msk [vmem:[%s3227_s27 + $0x230] sm:$0xff] %vm223_vm1, %v2020_v11  ;;  %1893 = vst.msk [vmem:[#allocation2 + $0x250] sm:$0xff] %vm223_vm1, %v1764_v5  ;;  %v1765_v19 = vadd.f32 %v2596_v15, %v427_v3  ;;  %v1470_v21 = vpop.f32.mrb[11].mxu1  ;;  %v1699_v24 = vadd.f32 %v1214_v20, %v361_v8  ;;  %v434_v61 = vld [vmem:[#allocation2 + $0x290] sm:$0xff]  ;;  %v371_v2 = vld [vmem:[#allocation2 + $0x98] sm:$0xff] }
  0xfb   : > { %v1954_v16 = vld [vmem:[#allocation2 + $0x20] sm:$0xff]  ;;  %1827 = vst.msk [vmem:[#allocation2 + $0x40] sm:$0xff] %vm223_vm1, %v1698_v12  ;;  %1891 = vst.msk [vmem:[#allocation2 + $0x240] sm:$0xff] %vm223_vm1, %v1762_v13  ;;  %v1763_v25 = vadd.f32 %v1470_v21, %v425_v9  ;;  %v435_v3 = vld [vmem:[#allocation2 + $0x298] sm:$0xff] }
  0xfc   : > { %v2018_v17 = vld [vmem:[#allocation2 + $0x220] sm:$0xff]  ;;  %2082 = vst.msk [vmem:[%s3227_s27 + $0x20] sm:$0xff] %vm223_vm1, %v1954_v16  ;;  %1830 = vst.msk [vmem:[#allocation2 + $0x58] sm:$0xff] %vm223_vm1, %v1701_v18  ;;  %v369_v8 = vld [vmem:[#allocation2 + $0x88] sm:$0xff] }
  0xfd   : > { %2146 = vst.msk [vmem:[%s3227_s27 + $0x220] sm:$0xff] %vm223_vm1, %v2018_v17  ;;  %v1957_v22 = vld [vmem:[#allocation2 + $0x38] sm:$0xff]  ;;  %1894 = vst.msk [vmem:[#allocation2 + $0x258] sm:$0xff] %vm223_vm1, %v1765_v19  ;;  %v433_v9 = vld [vmem:[#allocation2 + $0x288] sm:$0xff] }
  0xfe   : > { %v2021_v23 = vld [vmem:[#allocation2 + $0x238] sm:$0xff]  ;;  %2085 = vst.msk [vmem:[%s3227_s27 + $0x38] sm:$0xff] %vm223_vm1, %v1957_v22  ;;  %1828 = vst.msk [vmem:[#allocation2 + $0x48] sm:$0xff] %vm223_vm1, %v1699_v24  ;;  %v2535_v32 = vpop.f32.mrb[12].mxu0 }
  0xff   : > { %2149 = vst.msk [vmem:[%s3227_s27 + $0x238] sm:$0xff] %vm223_vm1, %v2021_v23  ;;  %v1955_v26 = vld [vmem:[#allocation2 + $0x28] sm:$0xff]  ;;  %1892 = vst.msk [vmem:[#allocation2 + $0x248] sm:$0xff] %vm223_vm1, %v1763_v25  ;;  %v2599_v33 = vpop.f32.mrb[12].mxu1  ;;  %v1704_v36 = vadd.f32 %v2535_v32, %v366_v28  ;;  %v1227_v38 = vpop.f32.mrb[13].mxu0  ;;  %v374_v28 = vld [vmem:[#allocation2 + $0xb0] sm:$0xff] }
 0x100   : > { %v2019_v27 = vld [vmem:[#allocation2 + $0x228] sm:$0xff]  ;;  %2083 = vst.msk [vmem:[%s3227_s27 + $0x28] sm:$0xff] %vm223_vm1, %v1955_v26  ;;  %v1768_v37 = vadd.f32 %v2599_v33, %v430_v29  ;;  %v1483_v39 = vpop.f32.mrb[13].mxu1  ;;  %v1960_v42 = vld [vmem:[#allocation2 + $0x50] sm:$0xff]  ;;  %v1702_v44 = vadd.f32 %v1227_v38, %v364_v30  ;;  %v2536_v46 = vpop.f32.mrb[14].mxu0  ;;  %v372_v30 = vld [vmem:[#allocation2 + $0xa0] sm:$0xff] }
 0x101   : > { %2147 = vst.msk [vmem:[%s3227_s27 + $0x228] sm:$0xff] %vm223_vm1, %v2019_v27  ;;  %v2024_v43 = vld [vmem:[#allocation2 + $0x250] sm:$0xff]  ;;  %v1766_v45 = vadd.f32 %v1483_v39, %v428_v31  ;;  %v2600_v47 = vpop.f32.mrb[14].mxu1  ;;  %2088 = vst.msk [vmem:[%s3227_s27 + $0x50] sm:$0xff] %vm223_vm1, %v1960_v42  ;;  %v1705_v50 = vadd.f32 %v2536_v46, %v367_v34  ;;  %v1230_v52 = vpop.f32.mrb[15].mxu0  ;;  %v436_v31 = vld [vmem:[#allocation2 + $0x2a0] sm:$0xff] }
 0x102   : > { %2152 = vst.msk [vmem:[%s3227_s27 + $0x250] sm:$0xff] %vm223_vm1, %v2024_v43  ;;  %v1958_v48 = vld [vmem:[#allocation2 + $0x40] sm:$0xff]  ;;  %1833 = vst.msk [vmem:[#allocation2 + $0x70] sm:$0xff] %vm223_vm1, %v1704_v36  ;;  %v1769_v51 = vadd.f32 %v2600_v47, %v431_v35  ;;  %v1486_v53 = vpop.f32.mrb[15].mxu1  ;;  %v1703_v56 = vadd.f32 %v1230_v52, %v365_v40  ;;  %v438_v29 = vld [vmem:[#allocation2 + $0x2b0] sm:$0xff] }
 0x103   : > { %v2022_v49 = vld [vmem:[#allocation2 + $0x240] sm:$0xff]  ;;  %1897 = vst.msk [vmem:[#allocation2 + $0x270] sm:$0xff] %vm223_vm1, %v1768_v37  ;;  %2086 = vst.msk [vmem:[%s3227_s27 + $0x40] sm:$0xff] %vm223_vm1, %v1958_v48  ;;  %v1961_v54 = vld [vmem:[#allocation2 + $0x58] sm:$0xff]  ;;  %v1767_v57 = vadd.f32 %v1486_v53, %v429_v41 }
 0x104   : > { %2150 = vst.msk [vmem:[%s3227_s27 + $0x240] sm:$0xff] %vm223_vm1, %v2022_v49  ;;  %v2025_v55 = vld [vmem:[#allocation2 + $0x258] sm:$0xff]  ;;  %1831 = vst.msk [vmem:[#allocation2 + $0x60] sm:$0xff] %vm223_vm1, %v1702_v44  ;;  %v373_v40 = vld [vmem:[#allocation2 + $0xa8] sm:$0xff] }
 0x105   : > { %1895 = vst.msk [vmem:[#allocation2 + $0x260] sm:$0xff] %vm223_vm1, %v1766_v45  ;;  %2089 = vst.msk [vmem:[%s3227_s27 + $0x58] sm:$0xff] %vm223_vm1, %v1961_v54  ;;  %v1959_v58 = vld [vmem:[#allocation2 + $0x48] sm:$0xff]  ;;  %v375_v34 = vld [vmem:[#allocation2 + $0xb8] sm:$0xff] }
 0x106   : > { %2153 = vst.msk [vmem:[%s3227_s27 + $0x258] sm:$0xff] %vm223_vm1, %v2025_v55  ;;  %v2023_v59 = vld [vmem:[#allocation2 + $0x248] sm:$0xff]  ;;  %1834 = vst.msk [vmem:[#allocation2 + $0x78] sm:$0xff] %vm223_vm1, %v1705_v50  ;;  %v2539_v0 = vpop.f32.mrb[16].mxu0  ;;  %v439_v35 = vld [vmem:[#allocation2 + $0x2b8] sm:$0xff] }
 0x107   : > { %1898 = vst.msk [vmem:[#allocation2 + $0x278] sm:$0xff] %vm223_vm1, %v1769_v51  ;;  %2087 = vst.msk [vmem:[%s3227_s27 + $0x48] sm:$0xff] %vm223_vm1, %v1959_v58  ;;  %v2603_v1 = vpop.f32.mrb[16].mxu1  ;;  %v1708_v4 = vadd.f32 %v2539_v0, %v370_v60  ;;  %v1243_v6 = vpop.f32.mrb[17].mxu0  ;;  %v437_v41 = vld [vmem:[#allocation2 + $0x2a8] sm:$0xff]  ;;  %v378_v60 = vld [vmem:[#allocation2 + $0xd0] sm:$0xff] }
 0x108   : > { %2151 = vst.msk [vmem:[%s3227_s27 + $0x248] sm:$0xff] %vm223_vm1, %v2023_v59  ;;  %1832 = vst.msk [vmem:[#allocation2 + $0x68] sm:$0xff] %vm223_vm1, %v1703_v56  ;;  %v1772_v5 = vadd.f32 %v2603_v1, %v434_v61  ;;  %v1499_v7 = vpop.f32.mrb[17].mxu1  ;;  %v1706_v12 = vadd.f32 %v1243_v6, %v368_v62  ;;  %v2540_v14 = vpop.f32.mrb[18].mxu0  ;;  %v442_v61 = vld [vmem:[#allocation2 + $0x2d0] sm:$0xff]  ;;  %v376_v62 = vld [vmem:[#allocation2 + $0xc0] sm:$0xff] }
 0x109   : > { %1896 = vst.msk [vmem:[#allocation2 + $0x268] sm:$0xff] %vm223_vm1, %v1767_v57  ;;  %v1964_v10 = vld [vmem:[#allocation2 + $0x70] sm:$0xff]  ;;  %v1770_v13 = vadd.f32 %v1499_v7, %v432_v63  ;;  %v2604_v15 = vpop.f32.mrb[18].mxu1  ;;  %1837 = vst.msk [vmem:[#allocation2 + $0x90] sm:$0xff] %vm223_vm1, %v1708_v4  ;;  %v1709_v18 = vadd.f32 %v2540_v14, %v371_v2  ;;  %v1246_v20 = vpop.f32.mrb[19].mxu0  ;;  %v440_v63 = vld [vmem:[#allocation2 + $0x2c0] sm:$0xff] }
 0x10a   : > { %v2028_v11 = vld [vmem:[#allocation2 + $0x270] sm:$0xff]  ;;  %2092 = vst.msk [vmem:[%s3227_s27 + $0x70] sm:$0xff] %vm223_vm1, %v1964_v10  ;;  %1901 = vst.msk [vmem:[#allocation2 + $0x290] sm:$0xff] %vm223_vm1, %v1772_v5  ;;  %v1773_v19 = vadd.f32 %v2604_v15, %v435_v3  ;;  %v1502_v21 = vpop.f32.mrb[19].mxu1  ;;  %v1707_v24 = vadd.f32 %v1246_v20, %v369_v8  ;;  %v379_v2 = vld [vmem:[#allocation2 + $0xd8] sm:$0xff] }
 0x10b   : > { %2156 = vst.msk [vmem:[%s3227_s27 + $0x270] sm:$0xff] %vm223_vm1, %v2028_v11  ;;  %v1962_v16 = vld [vmem:[#allocation2 + $0x60] sm:$0xff]  ;;  %1835 = vst.msk [vmem:[#allocation2 + $0x80] sm:$0xff] %vm223_vm1, %v1706_v12  ;;  %v1771_v25 = vadd.f32 %v1502_v21, %v433_v9  ;;  %v443_v3 = vld [vmem:[#allocation2 + $0x2d8] sm:$0xff] }
 0x10c   : > { %v2026_v17 = vld [vmem:[#allocation2 + $0x260] sm:$0xff]  ;;  %2090 = vst.msk [vmem:[%s3227_s27 + $0x60] sm:$0xff] %vm223_vm1, %v1962_v16  ;;  %1899 = vst.msk [vmem:[#allocation2 + $0x280] sm:$0xff] %vm223_vm1, %v1770_v13  ;;  %v377_v8 = vld [vmem:[#allocation2 + $0xc8] sm:$0xff] }
 0x10d   : > { %2154 = vst.msk [vmem:[%s3227_s27 + $0x260] sm:$0xff] %vm223_vm1, %v2026_v17  ;;  %v1965_v22 = vld [vmem:[#allocation2 + $0x78] sm:$0xff]  ;;  %1838 = vst.msk [vmem:[#allocation2 + $0x98] sm:$0xff] %vm223_vm1, %v1709_v18  ;;  %v441_v9 = vld [vmem:[#allocation2 + $0x2c8] sm:$0xff] }
 0x10e   : > { %v2029_v23 = vld [vmem:[#allocation2 + $0x278] sm:$0xff]  ;;  %2093 = vst.msk [vmem:[%s3227_s27 + $0x78] sm:$0xff] %vm223_vm1, %v1965_v22  ;;  %1902 = vst.msk [vmem:[#allocation2 + $0x298] sm:$0xff] %vm223_vm1, %v1773_v19  ;;  %v2543_v32 = vpop.f32.mrb[20].mxu0 }
 0x10f   : > { %2157 = vst.msk [vmem:[%s3227_s27 + $0x278] sm:$0xff] %vm223_vm1, %v2029_v23  ;;  %v1963_v26 = vld [vmem:[#allocation2 + $0x68] sm:$0xff]  ;;  %1836 = vst.msk [vmem:[#allocation2 + $0x88] sm:$0xff] %vm223_vm1, %v1707_v24  ;;  %v2607_v33 = vpop.f32.mrb[20].mxu1  ;;  %v1712_v36 = vadd.f32 %v2543_v32, %v374_v28  ;;  %v1259_v38 = vpop.f32.mrb[21].mxu0  ;;  %v382_v28 = vld [vmem:[#allocation2 + $0xf0] sm:$0xff] }
 0x110   : > { %v2027_v27 = vld [vmem:[#allocation2 + $0x268] sm:$0xff]  ;;  %2091 = vst.msk [vmem:[%s3227_s27 + $0x68] sm:$0xff] %vm223_vm1, %v1963_v26  ;;  %1900 = vst.msk [vmem:[#allocation2 + $0x288] sm:$0xff] %vm223_vm1, %v1771_v25  ;;  %v1776_v37 = vadd.f32 %v2607_v33, %v438_v29  ;;  %v1515_v39 = vpop.f32.mrb[21].mxu1  ;;  %v1968_v42 = vld [vmem:[#allocation2 + $0x90] sm:$0xff]  ;;  %v1710_v44 = vadd.f32 %v1259_v38, %v372_v30  ;;  %v2544_v46 = vpop.f32.mrb[22].mxu0 }
 0x111   : > { %2155 = vst.msk [vmem:[%s3227_s27 + $0x268] sm:$0xff] %vm223_vm1, %v2027_v27  ;;  %v2032_v43 = vld [vmem:[#allocation2 + $0x290] sm:$0xff]  ;;  %v1774_v45 = vadd.f32 %v1515_v39, %v436_v31  ;;  %v2608_v47 = vpop.f32.mrb[22].mxu1  ;;  %2096 = vst.msk [vmem:[%s3227_s27 + $0x90] sm:$0xff] %vm223_vm1, %v1968_v42  ;;  %v1713_v50 = vadd.f32 %v2544_v46, %v375_v34  ;;  %v1262_v52 = vpop.f32.mrb[23].mxu0  ;;  %v380_v30 = vld [vmem:[#allocation2 + $0xe0] sm:$0xff] }
 0x112   : > { %2160 = vst.msk [vmem:[%s3227_s27 + $0x290] sm:$0xff] %vm223_vm1, %v2032_v43  ;;  %v1966_v48 = vld [vmem:[#allocation2 + $0x80] sm:$0xff]  ;;  %1841 = vst.msk [vmem:[#allocation2 + $0xb0] sm:$0xff] %vm223_vm1, %v1712_v36  ;;  %v1777_v51 = vadd.f32 %v2608_v47, %v439_v35  ;;  %v1518_v53 = vpop.f32.mrb[23].mxu1  ;;  %v1711_v56 = vadd.f32 %v1262_v52, %v373_v40  ;;  %v446_v29 = vld [vmem:[#allocation2 + $0x2f0] sm:$0xff] }
 0x113   : > { %v2030_v49 = vld [vmem:[#allocation2 + $0x280] sm:$0xff]  ;;  %1905 = vst.msk [vmem:[#allocation2 + $0x2b0] sm:$0xff] %vm223_vm1, %v1776_v37  ;;  %2094 = vst.msk [vmem:[%s3227_s27 + $0x80] sm:$0xff] %vm223_vm1, %v1966_v48  ;;  %v1775_v57 = vadd.f32 %v1518_v53, %v437_v41  ;;  %v383_v34 = vld [vmem:[#allocation2 + $0xf8] sm:$0xff] }
 0x114   : > { %2158 = vst.msk [vmem:[%s3227_s27 + $0x280] sm:$0xff] %vm223_vm1, %v2030_v49  ;;  %v1969_v54 = vld [vmem:[#allocation2 + $0x98] sm:$0xff]  ;;  %1839 = vst.msk [vmem:[#allocation2 + $0xa0] sm:$0xff] %vm223_vm1, %v1710_v44  ;;  %v444_v31 = vld [vmem:[#allocation2 + $0x2e0] sm:$0xff] }
 0x115   : > { %v2033_v55 = vld [vmem:[#allocation2 + $0x298] sm:$0xff]  ;;  %1903 = vst.msk [vmem:[#allocation2 + $0x2a0] sm:$0xff] %vm223_vm1, %v1774_v45  ;;  %2097 = vst.msk [vmem:[%s3227_s27 + $0x98] sm:$0xff] %vm223_vm1, %v1969_v54  ;;  %v381_v40 = vld [vmem:[#allocation2 + $0xe8] sm:$0xff] }
 0x116   : > { %2161 = vst.msk [vmem:[%s3227_s27 + $0x298] sm:$0xff] %vm223_vm1, %v2033_v55  ;;  %v1967_v58 = vld [vmem:[#allocation2 + $0x88] sm:$0xff]  ;;  %1842 = vst.msk [vmem:[#allocation2 + $0xb8] sm:$0xff] %vm223_vm1, %v1713_v50  ;;  %v2547_v0 = vpop.f32.mrb[24].mxu0  ;;  %v447_v35 = vld [vmem:[#allocation2 + $0x2f8] sm:$0xff] }
 0x117   : > { %v2031_v59 = vld [vmem:[#allocation2 + $0x288] sm:$0xff]  ;;  %1906 = vst.msk [vmem:[#allocation2 + $0x2b8] sm:$0xff] %vm223_vm1, %v1777_v51  ;;  %2095 = vst.msk [vmem:[%s3227_s27 + $0x88] sm:$0xff] %vm223_vm1, %v1967_v58  ;;  %v2611_v1 = vpop.f32.mrb[24].mxu1  ;;  %v1716_v4 = vadd.f32 %v2547_v0, %v378_v60  ;;  %v1275_v6 = vpop.f32.mrb[25].mxu0  ;;  %v386_v60 = vld [vmem:[#allocation2 + $0x110] sm:$0xff] }
 0x118   : > { %2159 = vst.msk [vmem:[%s3227_s27 + $0x288] sm:$0xff] %vm223_vm1, %v2031_v59  ;;  %1840 = vst.msk [vmem:[#allocation2 + $0xa8] sm:$0xff] %vm223_vm1, %v1711_v56  ;;  %v1780_v5 = vadd.f32 %v2611_v1, %v442_v61  ;;  %v1531_v7 = vpop.f32.mrb[25].mxu1  ;;  %v1714_v12 = vadd.f32 %v1275_v6, %v376_v62  ;;  %v2548_v14 = vpop.f32.mrb[26].mxu0  ;;  %v445_v41 = vld [vmem:[#allocation2 + $0x2e8] sm:$0xff]  ;;  %v450_v61 = vld [vmem:[#allocation2 + $0x310] sm:$0xff] }
 0x119   : > { %1904 = vst.msk [vmem:[#allocation2 + $0x2a8] sm:$0xff] %vm223_vm1, %v1775_v57  ;;  %v1972_v10 = vld [vmem:[#allocation2 + $0xb0] sm:$0xff]  ;;  %v1778_v13 = vadd.f32 %v1531_v7, %v440_v63  ;;  %v2612_v15 = vpop.f32.mrb[26].mxu1  ;;  %1845 = vst.msk [vmem:[#allocation2 + $0xd0] sm:$0xff] %vm223_vm1, %v1716_v4  ;;  %v1717_v18 = vadd.f32 %v2548_v14, %v379_v2  ;;  %v1278_v20 = vpop.f32.mrb[27].mxu0  ;;  %v384_v62 = vld [vmem:[#allocation2 + $0x100] sm:$0xff] }
 0x11a   : > { %v2036_v11 = vld [vmem:[#allocation2 + $0x2b0] sm:$0xff]  ;;  %2100 = vst.msk [vmem:[%s3227_s27 + $0xb0] sm:$0xff] %vm223_vm1, %v1972_v10  ;;  %1909 = vst.msk [vmem:[#allocation2 + $0x2d0] sm:$0xff] %vm223_vm1, %v1780_v5  ;;  %v1781_v19 = vadd.f32 %v2612_v15, %v443_v3  ;;  %v1534_v21 = vpop.f32.mrb[27].mxu1  ;;  %v1715_v24 = vadd.f32 %v1278_v20, %v377_v8  ;;  %v448_v63 = vld [vmem:[#allocation2 + $0x300] sm:$0xff] }
 0x11b   : > { %2164 = vst.msk [vmem:[%s3227_s27 + $0x2b0] sm:$0xff] %vm223_vm1, %v2036_v11  ;;  %v1970_v16 = vld [vmem:[#allocation2 + $0xa0] sm:$0xff]  ;;  %1843 = vst.msk [vmem:[#allocation2 + $0xc0] sm:$0xff] %vm223_vm1, %v1714_v12  ;;  %v1779_v25 = vadd.f32 %v1534_v21, %v441_v9  ;;  %v387_v2 = vld [vmem:[#allocation2 + $0x118] sm:$0xff] }
 0x11c   : > { %v2034_v17 = vld [vmem:[#allocation2 + $0x2a0] sm:$0xff]  ;;  %2098 = vst.msk [vmem:[%s3227_s27 + $0xa0] sm:$0xff] %vm223_vm1, %v1970_v16  ;;  %1907 = vst.msk [vmem:[#allocation2 + $0x2c0] sm:$0xff] %vm223_vm1, %v1778_v13  ;;  %v451_v3 = vld [vmem:[#allocation2 + $0x318] sm:$0xff] }
 0x11d   : > { %2162 = vst.msk [vmem:[%s3227_s27 + $0x2a0] sm:$0xff] %vm223_vm1, %v2034_v17  ;;  %v1973_v22 = vld [vmem:[#allocation2 + $0xb8] sm:$0xff]  ;;  %1846 = vst.msk [vmem:[#allocation2 + $0xd8] sm:$0xff] %vm223_vm1, %v1717_v18  ;;  %v385_v8 = vld [vmem:[#allocation2 + $0x108] sm:$0xff] }
 0x11e   : > { %v2037_v23 = vld [vmem:[#allocation2 + $0x2b8] sm:$0xff]  ;;  %2101 = vst.msk [vmem:[%s3227_s27 + $0xb8] sm:$0xff] %vm223_vm1, %v1973_v22  ;;  %1910 = vst.msk [vmem:[#allocation2 + $0x2d8] sm:$0xff] %vm223_vm1, %v1781_v19  ;;  %v2551_v32 = vpop.f32.mrb[28].mxu0  ;;  %v449_v9 = vld [vmem:[#allocation2 + $0x308] sm:$0xff] }
 0x11f   : > { %2165 = vst.msk [vmem:[%s3227_s27 + $0x2b8] sm:$0xff] %vm223_vm1, %v2037_v23  ;;  %v1971_v26 = vld [vmem:[#allocation2 + $0xa8] sm:$0xff]  ;;  %1844 = vst.msk [vmem:[#allocation2 + $0xc8] sm:$0xff] %vm223_vm1, %v1715_v24  ;;  %v2615_v33 = vpop.f32.mrb[28].mxu1  ;;  %v1720_v36 = vadd.f32 %v2551_v32, %v382_v28  ;;  %v1291_v38 = vpop.f32.mrb[29].mxu0  ;;  %v390_v28 = vld [vmem:[#allocation2 + $0x130] sm:$0xff] }
 0x120   : > { %v2035_v27 = vld [vmem:[#allocation2 + $0x2a8] sm:$0xff]  ;;  %2099 = vst.msk [vmem:[%s3227_s27 + $0xa8] sm:$0xff] %vm223_vm1, %v1971_v26  ;;  %1908 = vst.msk [vmem:[#allocation2 + $0x2c8] sm:$0xff] %vm223_vm1, %v1779_v25  ;;  %v1784_v37 = vadd.f32 %v2615_v33, %v446_v29  ;;  %v1547_v39 = vpop.f32.mrb[29].mxu1  ;;  %v1976_v42 = vld [vmem:[#allocation2 + $0xd0] sm:$0xff]  ;;  %v1718_v44 = vadd.f32 %v1291_v38, %v380_v30  ;;  %v2552_v46 = vpop.f32.mrb[30].mxu0 }
 0x121   : > { %2163 = vst.msk [vmem:[%s3227_s27 + $0x2a8] sm:$0xff] %vm223_vm1, %v2035_v27  ;;  %v2040_v43 = vld [vmem:[#allocation2 + $0x2d0] sm:$0xff]  ;;  %v1782_v45 = vadd.f32 %v1547_v39, %v444_v31  ;;  %v2616_v47 = vpop.f32.mrb[30].mxu1  ;;  %2104 = vst.msk [vmem:[%s3227_s27 + $0xd0] sm:$0xff] %vm223_vm1, %v1976_v42  ;;  %v1721_v50 = vadd.f32 %v2552_v46, %v383_v34  ;;  %v1294_v52 = vpop.f32.mrb[31].mxu0  ;;  %v388_v30 = vld [vmem:[#allocation2 + $0x120] sm:$0xff] }
 0x122   : > { %2168 = vst.msk [vmem:[%s3227_s27 + $0x2d0] sm:$0xff] %vm223_vm1, %v2040_v43  ;;  %v1974_v48 = vld [vmem:[#allocation2 + $0xc0] sm:$0xff]  ;;  %1849 = vst.msk [vmem:[#allocation2 + $0xf0] sm:$0xff] %vm223_vm1, %v1720_v36  ;;  %v1785_v51 = vadd.f32 %v2616_v47, %v447_v35  ;;  %v1550_v53 = vpop.f32.mrb[31].mxu1  ;;  %v1719_v56 = vadd.f32 %v1294_v52, %v381_v40  ;;  %v454_v29 = vld [vmem:[#allocation2 + $0x330] sm:$0xff] }
 0x123   : > { %v2038_v49 = vld [vmem:[#allocation2 + $0x2c0] sm:$0xff]  ;;  %1913 = vst.msk [vmem:[#allocation2 + $0x2f0] sm:$0xff] %vm223_vm1, %v1784_v37  ;;  %2102 = vst.msk [vmem:[%s3227_s27 + $0xc0] sm:$0xff] %vm223_vm1, %v1974_v48  ;;  %v1783_v57 = vadd.f32 %v1550_v53, %v445_v41  ;;  %v391_v34 = vld [vmem:[#allocation2 + $0x138] sm:$0xff] }
 0x124   : > { %2166 = vst.msk [vmem:[%s3227_s27 + $0x2c0] sm:$0xff] %vm223_vm1, %v2038_v49  ;;  %v1977_v54 = vld [vmem:[#allocation2 + $0xd8] sm:$0xff]  ;;  %1847 = vst.msk [vmem:[#allocation2 + $0xe0] sm:$0xff] %vm223_vm1, %v1718_v44  ;;  %v452_v31 = vld [vmem:[#allocation2 + $0x320] sm:$0xff] }
 0x125   : > { %v2041_v55 = vld [vmem:[#allocation2 + $0x2d8] sm:$0xff]  ;;  %1911 = vst.msk [vmem:[#allocation2 + $0x2e0] sm:$0xff] %vm223_vm1, %v1782_v45  ;;  %2105 = vst.msk [vmem:[%s3227_s27 + $0xd8] sm:$0xff] %vm223_vm1, %v1977_v54  ;;  %v389_v40 = vld [vmem:[#allocation2 + $0x128] sm:$0xff] }
 0x126   : > { %2169 = vst.msk [vmem:[%s3227_s27 + $0x2d8] sm:$0xff] %vm223_vm1, %v2041_v55  ;;  %v1975_v58 = vld [vmem:[#allocation2 + $0xc8] sm:$0xff]  ;;  %1850 = vst.msk [vmem:[#allocation2 + $0xf8] sm:$0xff] %vm223_vm1, %v1721_v50  ;;  %v2555_v0 = vpop.f32.mrb[32].mxu0  ;;  %v455_v35 = vld [vmem:[#allocation2 + $0x338] sm:$0xff] }
 0x127   : > { %v2039_v59 = vld [vmem:[#allocation2 + $0x2c8] sm:$0xff]  ;;  %1914 = vst.msk [vmem:[#allocation2 + $0x2f8] sm:$0xff] %vm223_vm1, %v1785_v51  ;;  %2103 = vst.msk [vmem:[%s3227_s27 + $0xc8] sm:$0xff] %vm223_vm1, %v1975_v58  ;;  %v2619_v1 = vpop.f32.mrb[32].mxu1  ;;  %v1724_v4 = vadd.f32 %v2555_v0, %v386_v60  ;;  %v1307_v6 = vpop.f32.mrb[33].mxu0  ;;  %v394_v60 = vld [vmem:[#allocation2 + $0x150] sm:$0xff] }
 0x128   : > { %2167 = vst.msk [vmem:[%s3227_s27 + $0x2c8] sm:$0xff] %vm223_vm1, %v2039_v59  ;;  %1848 = vst.msk [vmem:[#allocation2 + $0xe8] sm:$0xff] %vm223_vm1, %v1719_v56  ;;  %v1788_v5 = vadd.f32 %v2619_v1, %v450_v61  ;;  %v1563_v7 = vpop.f32.mrb[33].mxu1  ;;  %v1722_v12 = vadd.f32 %v1307_v6, %v384_v62  ;;  %v2556_v14 = vpop.f32.mrb[34].mxu0  ;;  %v453_v41 = vld [vmem:[#allocation2 + $0x328] sm:$0xff]  ;;  %v458_v61 = vld [vmem:[#allocation2 + $0x350] sm:$0xff] }
 0x129   : > { %1912 = vst.msk [vmem:[#allocation2 + $0x2e8] sm:$0xff] %vm223_vm1, %v1783_v57  ;;  %v1980_v10 = vld [vmem:[#allocation2 + $0xf0] sm:$0xff]  ;;  %v1786_v13 = vadd.f32 %v1563_v7, %v448_v63  ;;  %v2620_v15 = vpop.f32.mrb[34].mxu1  ;;  %1853 = vst.msk [vmem:[#allocation2 + $0x110] sm:$0xff] %vm223_vm1, %v1724_v4  ;;  %v1725_v18 = vadd.f32 %v2556_v14, %v387_v2  ;;  %v1310_v20 = vpop.f32.mrb[35].mxu0  ;;  %v392_v62 = vld [vmem:[#allocation2 + $0x140] sm:$0xff] }
 0x12a   : > { %v2044_v11 = vld [vmem:[#allocation2 + $0x2f0] sm:$0xff]  ;;  %2108 = vst.msk [vmem:[%s3227_s27 + $0xf0] sm:$0xff] %vm223_vm1, %v1980_v10  ;;  %1917 = vst.msk [vmem:[#allocation2 + $0x310] sm:$0xff] %vm223_vm1, %v1788_v5  ;;  %v1789_v19 = vadd.f32 %v2620_v15, %v451_v3  ;;  %v1566_v21 = vpop.f32.mrb[35].mxu1  ;;  %v1723_v24 = vadd.f32 %v1310_v20, %v385_v8  ;;  %v456_v63 = vld [vmem:[#allocation2 + $0x340] sm:$0xff] }
 0x12b   : > { %2172 = vst.msk [vmem:[%s3227_s27 + $0x2f0] sm:$0xff] %vm223_vm1, %v2044_v11  ;;  %v1978_v16 = vld [vmem:[#allocation2 + $0xe0] sm:$0xff]  ;;  %1851 = vst.msk [vmem:[#allocation2 + $0x100] sm:$0xff] %vm223_vm1, %v1722_v12  ;;  %v1787_v25 = vadd.f32 %v1566_v21, %v449_v9  ;;  %v395_v2 = vld [vmem:[#allocation2 + $0x158] sm:$0xff] }
 0x12c   : > { %v2042_v17 = vld [vmem:[#allocation2 + $0x2e0] sm:$0xff]  ;;  %2106 = vst.msk [vmem:[%s3227_s27 + $0xe0] sm:$0xff] %vm223_vm1, %v1978_v16  ;;  %1915 = vst.msk [vmem:[#allocation2 + $0x300] sm:$0xff] %vm223_vm1, %v1786_v13  ;;  %v459_v3 = vld [vmem:[#allocation2 + $0x358] sm:$0xff] }
 0x12d   : > { %2170 = vst.msk [vmem:[%s3227_s27 + $0x2e0] sm:$0xff] %vm223_vm1, %v2042_v17  ;;  %v1981_v22 = vld [vmem:[#allocation2 + $0xf8] sm:$0xff]  ;;  %1854 = vst.msk [vmem:[#allocation2 + $0x118] sm:$0xff] %vm223_vm1, %v1725_v18  ;;  %v393_v8 = vld [vmem:[#allocation2 + $0x148] sm:$0xff] }
 0x12e   : > { %v2045_v23 = vld [vmem:[#allocation2 + $0x2f8] sm:$0xff]  ;;  %2109 = vst.msk [vmem:[%s3227_s27 + $0xf8] sm:$0xff] %vm223_vm1, %v1981_v22  ;;  %1918 = vst.msk [vmem:[#allocation2 + $0x318] sm:$0xff] %vm223_vm1, %v1789_v19  ;;  %v2559_v32 = vpop.f32.mrb[36].mxu0  ;;  %v457_v9 = vld [vmem:[#allocation2 + $0x348] sm:$0xff] }
 0x12f   : > { %2173 = vst.msk [vmem:[%s3227_s27 + $0x2f8] sm:$0xff] %vm223_vm1, %v2045_v23  ;;  %v1979_v26 = vld [vmem:[#allocation2 + $0xe8] sm:$0xff]  ;;  %1852 = vst.msk [vmem:[#allocation2 + $0x108] sm:$0xff] %vm223_vm1, %v1723_v24  ;;  %v2623_v33 = vpop.f32.mrb[36].mxu1  ;;  %v1728_v36 = vadd.f32 %v2559_v32, %v390_v28  ;;  %v1323_v38 = vpop.f32.mrb[37].mxu0  ;;  %v398_v28 = vld [vmem:[#allocation2 + $0x170] sm:$0xff] }
 0x130   : > { %v2043_v27 = vld [vmem:[#allocation2 + $0x2e8] sm:$0xff]  ;;  %2107 = vst.msk [vmem:[%s3227_s27 + $0xe8] sm:$0xff] %vm223_vm1, %v1979_v26  ;;  %1916 = vst.msk [vmem:[#allocation2 + $0x308] sm:$0xff] %vm223_vm1, %v1787_v25  ;;  %v1792_v37 = vadd.f32 %v2623_v33, %v454_v29  ;;  %v1579_v39 = vpop.f32.mrb[37].mxu1  ;;  %v1984_v42 = vld [vmem:[#allocation2 + $0x110] sm:$0xff]  ;;  %v1726_v44 = vadd.f32 %v1323_v38, %v388_v30  ;;  %v2560_v46 = vpop.f32.mrb[38].mxu0 }
 0x131   : > { %2171 = vst.msk [vmem:[%s3227_s27 + $0x2e8] sm:$0xff] %vm223_vm1, %v2043_v27  ;;  %v2048_v43 = vld [vmem:[#allocation2 + $0x310] sm:$0xff]  ;;  %v1790_v45 = vadd.f32 %v1579_v39, %v452_v31  ;;  %v2624_v47 = vpop.f32.mrb[38].mxu1  ;;  %2112 = vst.msk [vmem:[%s3227_s27 + $0x110] sm:$0xff] %vm223_vm1, %v1984_v42  ;;  %v1729_v50 = vadd.f32 %v2560_v46, %v391_v34  ;;  %v1326_v52 = vpop.f32.mrb[39].mxu0  ;;  %v396_v30 = vld [vmem:[#allocation2 + $0x160] sm:$0xff] }
 0x132   : > { %2176 = vst.msk [vmem:[%s3227_s27 + $0x310] sm:$0xff] %vm223_vm1, %v2048_v43  ;;  %v1982_v48 = vld [vmem:[#allocation2 + $0x100] sm:$0xff]  ;;  %1857 = vst.msk [vmem:[#allocation2 + $0x130] sm:$0xff] %vm223_vm1, %v1728_v36  ;;  %v1793_v51 = vadd.f32 %v2624_v47, %v455_v35  ;;  %v1582_v53 = vpop.f32.mrb[39].mxu1  ;;  %v1727_v56 = vadd.f32 %v1326_v52, %v389_v40  ;;  %v462_v29 = vld [vmem:[#allocation2 + $0x370] sm:$0xff] }
 0x133   : > { %v2046_v49 = vld [vmem:[#allocation2 + $0x300] sm:$0xff]  ;;  %1921 = vst.msk [vmem:[#allocation2 + $0x330] sm:$0xff] %vm223_vm1, %v1792_v37  ;;  %2110 = vst.msk [vmem:[%s3227_s27 + $0x100] sm:$0xff] %vm223_vm1, %v1982_v48  ;;  %v1791_v57 = vadd.f32 %v1582_v53, %v453_v41  ;;  %v399_v34 = vld [vmem:[#allocation2 + $0x178] sm:$0xff] }
 0x134   : > { %2174 = vst.msk [vmem:[%s3227_s27 + $0x300] sm:$0xff] %vm223_vm1, %v2046_v49  ;;  %v1985_v54 = vld [vmem:[#allocation2 + $0x118] sm:$0xff]  ;;  %1855 = vst.msk [vmem:[#allocation2 + $0x120] sm:$0xff] %vm223_vm1, %v1726_v44  ;;  %v460_v31 = vld [vmem:[#allocation2 + $0x360] sm:$0xff] }
 0x135   : > { %v2049_v55 = vld [vmem:[#allocation2 + $0x318] sm:$0xff]  ;;  %1919 = vst.msk [vmem:[#allocation2 + $0x320] sm:$0xff] %vm223_vm1, %v1790_v45  ;;  %2113 = vst.msk [vmem:[%s3227_s27 + $0x118] sm:$0xff] %vm223_vm1, %v1985_v54  ;;  %v397_v40 = vld [vmem:[#allocation2 + $0x168] sm:$0xff] }
 0x136   : > { %2177 = vst.msk [vmem:[%s3227_s27 + $0x318] sm:$0xff] %vm223_vm1, %v2049_v55  ;;  %v1983_v58 = vld [vmem:[#allocation2 + $0x108] sm:$0xff]  ;;  %1858 = vst.msk [vmem:[#allocation2 + $0x138] sm:$0xff] %vm223_vm1, %v1729_v50  ;;  %v2563_v0 = vpop.f32.mrb[40].mxu0  ;;  %v463_v35 = vld [vmem:[#allocation2 + $0x378] sm:$0xff] }
 0x137   : > { %v2047_v59 = vld [vmem:[#allocation2 + $0x308] sm:$0xff]  ;;  %1922 = vst.msk [vmem:[#allocation2 + $0x338] sm:$0xff] %vm223_vm1, %v1793_v51  ;;  %2111 = vst.msk [vmem:[%s3227_s27 + $0x108] sm:$0xff] %vm223_vm1, %v1983_v58  ;;  %v2627_v1 = vpop.f32.mrb[40].mxu1  ;;  %v1732_v4 = vadd.f32 %v2563_v0, %v394_v60  ;;  %v1339_v6 = vpop.f32.mrb[41].mxu0  ;;  %v402_v60 = vld [vmem:[#allocation2 + $0x190] sm:$0xff] }
 0x138   : > { %2175 = vst.msk [vmem:[%s3227_s27 + $0x308] sm:$0xff] %vm223_vm1, %v2047_v59  ;;  %1856 = vst.msk [vmem:[#allocation2 + $0x128] sm:$0xff] %vm223_vm1, %v1727_v56  ;;  %v1796_v5 = vadd.f32 %v2627_v1, %v458_v61  ;;  %v1595_v7 = vpop.f32.mrb[41].mxu1  ;;  %v1730_v12 = vadd.f32 %v1339_v6, %v392_v62  ;;  %v2564_v14 = vpop.f32.mrb[42].mxu0  ;;  %v461_v41 = vld [vmem:[#allocation2 + $0x368] sm:$0xff]  ;;  %v466_v61 = vld [vmem:[#allocation2 + $0x390] sm:$0xff] }
 0x139   : > { %1920 = vst.msk [vmem:[#allocation2 + $0x328] sm:$0xff] %vm223_vm1, %v1791_v57  ;;  %v1988_v10 = vld [vmem:[#allocation2 + $0x130] sm:$0xff]  ;;  %v1794_v13 = vadd.f32 %v1595_v7, %v456_v63  ;;  %v2628_v15 = vpop.f32.mrb[42].mxu1  ;;  %1861 = vst.msk [vmem:[#allocation2 + $0x150] sm:$0xff] %vm223_vm1, %v1732_v4  ;;  %v1733_v18 = vadd.f32 %v2564_v14, %v395_v2  ;;  %v1342_v20 = vpop.f32.mrb[43].mxu0  ;;  %v400_v62 = vld [vmem:[#allocation2 + $0x180] sm:$0xff] }
 0x13a   : > { %v2052_v11 = vld [vmem:[#allocation2 + $0x330] sm:$0xff]  ;;  %2116 = vst.msk [vmem:[%s3227_s27 + $0x130] sm:$0xff] %vm223_vm1, %v1988_v10  ;;  %1925 = vst.msk [vmem:[#allocation2 + $0x350] sm:$0xff] %vm223_vm1, %v1796_v5  ;;  %v1797_v19 = vadd.f32 %v2628_v15, %v459_v3  ;;  %v1598_v21 = vpop.f32.mrb[43].mxu1  ;;  %v1731_v24 = vadd.f32 %v1342_v20, %v393_v8  ;;  %v464_v63 = vld [vmem:[#allocation2 + $0x380] sm:$0xff] }
 0x13b   : > { %2180 = vst.msk [vmem:[%s3227_s27 + $0x330] sm:$0xff] %vm223_vm1, %v2052_v11  ;;  %v1986_v16 = vld [vmem:[#allocation2 + $0x120] sm:$0xff]  ;;  %1859 = vst.msk [vmem:[#allocation2 + $0x140] sm:$0xff] %vm223_vm1, %v1730_v12  ;;  %v1795_v25 = vadd.f32 %v1598_v21, %v457_v9  ;;  %v403_v2 = vld [vmem:[#allocation2 + $0x198] sm:$0xff] }
 0x13c   : > { %v2050_v17 = vld [vmem:[#allocation2 + $0x320] sm:$0xff]  ;;  %2114 = vst.msk [vmem:[%s3227_s27 + $0x120] sm:$0xff] %vm223_vm1, %v1986_v16  ;;  %1923 = vst.msk [vmem:[#allocation2 + $0x340] sm:$0xff] %vm223_vm1, %v1794_v13  ;;  %v467_v3 = vld [vmem:[#allocation2 + $0x398] sm:$0xff] }
 0x13d   : > { %2178 = vst.msk [vmem:[%s3227_s27 + $0x320] sm:$0xff] %vm223_vm1, %v2050_v17  ;;  %v1989_v22 = vld [vmem:[#allocation2 + $0x138] sm:$0xff]  ;;  %1862 = vst.msk [vmem:[#allocation2 + $0x158] sm:$0xff] %vm223_vm1, %v1733_v18  ;;  %v401_v8 = vld [vmem:[#allocation2 + $0x188] sm:$0xff] }
 0x13e   : > { %v2053_v23 = vld [vmem:[#allocation2 + $0x338] sm:$0xff]  ;;  %2117 = vst.msk [vmem:[%s3227_s27 + $0x138] sm:$0xff] %vm223_vm1, %v1989_v22  ;;  %1926 = vst.msk [vmem:[#allocation2 + $0x358] sm:$0xff] %vm223_vm1, %v1797_v19  ;;  %v2567_v32 = vpop.f32.mrb[44].mxu0  ;;  %v465_v9 = vld [vmem:[#allocation2 + $0x388] sm:$0xff] }
 0x13f   : > { %2181 = vst.msk [vmem:[%s3227_s27 + $0x338] sm:$0xff] %vm223_vm1, %v2053_v23  ;;  %v1987_v26 = vld [vmem:[#allocation2 + $0x128] sm:$0xff]  ;;  %1860 = vst.msk [vmem:[#allocation2 + $0x148] sm:$0xff] %vm223_vm1, %v1731_v24  ;;  %v2631_v33 = vpop.f32.mrb[44].mxu1  ;;  %v1736_v36 = vadd.f32 %v2567_v32, %v398_v28  ;;  %v1355_v38 = vpop.f32.mrb[45].mxu0  ;;  %v406_v28 = vld [vmem:[#allocation2 + $0x1b0] sm:$0xff] }
 0x140   : > { %v2051_v27 = vld [vmem:[#allocation2 + $0x328] sm:$0xff]  ;;  %2115 = vst.msk [vmem:[%s3227_s27 + $0x128] sm:$0xff] %vm223_vm1, %v1987_v26  ;;  %1924 = vst.msk [vmem:[#allocation2 + $0x348] sm:$0xff] %vm223_vm1, %v1795_v25  ;;  %v1800_v37 = vadd.f32 %v2631_v33, %v462_v29  ;;  %v1611_v39 = vpop.f32.mrb[45].mxu1  ;;  %v1992_v42 = vld [vmem:[#allocation2 + $0x150] sm:$0xff]  ;;  %v1734_v44 = vadd.f32 %v1355_v38, %v396_v30  ;;  %v2568_v46 = vpop.f32.mrb[46].mxu0 }
 0x141   : > { %2179 = vst.msk [vmem:[%s3227_s27 + $0x328] sm:$0xff] %vm223_vm1, %v2051_v27  ;;  %v2056_v43 = vld [vmem:[#allocation2 + $0x350] sm:$0xff]  ;;  %v1798_v45 = vadd.f32 %v1611_v39, %v460_v31  ;;  %v2632_v47 = vpop.f32.mrb[46].mxu1  ;;  %2120 = vst.msk [vmem:[%s3227_s27 + $0x150] sm:$0xff] %vm223_vm1, %v1992_v42  ;;  %v1737_v50 = vadd.f32 %v2568_v46, %v399_v34  ;;  %v1358_v52 = vpop.f32.mrb[47].mxu0  ;;  %v404_v30 = vld [vmem:[#allocation2 + $0x1a0] sm:$0xff] }
 0x142   : > { %2184 = vst.msk [vmem:[%s3227_s27 + $0x350] sm:$0xff] %vm223_vm1, %v2056_v43  ;;  %v1990_v48 = vld [vmem:[#allocation2 + $0x140] sm:$0xff]  ;;  %1865 = vst.msk [vmem:[#allocation2 + $0x170] sm:$0xff] %vm223_vm1, %v1736_v36  ;;  %v1801_v51 = vadd.f32 %v2632_v47, %v463_v35  ;;  %v1614_v53 = vpop.f32.mrb[47].mxu1  ;;  %v1735_v56 = vadd.f32 %v1358_v52, %v397_v40  ;;  %v470_v29 = vld [vmem:[#allocation2 + $0x3b0] sm:$0xff] }
 0x143   : > { %v2054_v49 = vld [vmem:[#allocation2 + $0x340] sm:$0xff]  ;;  %1929 = vst.msk [vmem:[#allocation2 + $0x370] sm:$0xff] %vm223_vm1, %v1800_v37  ;;  %2118 = vst.msk [vmem:[%s3227_s27 + $0x140] sm:$0xff] %vm223_vm1, %v1990_v48  ;;  %v1799_v57 = vadd.f32 %v1614_v53, %v461_v41  ;;  %v407_v34 = vld [vmem:[#allocation2 + $0x1b8] sm:$0xff] }
 0x144   : > { %2182 = vst.msk [vmem:[%s3227_s27 + $0x340] sm:$0xff] %vm223_vm1, %v2054_v49  ;;  %v1993_v54 = vld [vmem:[#allocation2 + $0x158] sm:$0xff]  ;;  %1863 = vst.msk [vmem:[#allocation2 + $0x160] sm:$0xff] %vm223_vm1, %v1734_v44  ;;  %v468_v31 = vld [vmem:[#allocation2 + $0x3a0] sm:$0xff] }
 0x145   : > { %v2057_v55 = vld [vmem:[#allocation2 + $0x358] sm:$0xff]  ;;  %1927 = vst.msk [vmem:[#allocation2 + $0x360] sm:$0xff] %vm223_vm1, %v1798_v45  ;;  %2121 = vst.msk [vmem:[%s3227_s27 + $0x158] sm:$0xff] %vm223_vm1, %v1993_v54  ;;  %v405_v40 = vld [vmem:[#allocation2 + $0x1a8] sm:$0xff] }
 0x146   : > { %2185 = vst.msk [vmem:[%s3227_s27 + $0x358] sm:$0xff] %vm223_vm1, %v2057_v55  ;;  %v1991_v58 = vld [vmem:[#allocation2 + $0x148] sm:$0xff]  ;;  %1866 = vst.msk [vmem:[#allocation2 + $0x178] sm:$0xff] %vm223_vm1, %v1737_v50  ;;  %v2571_v0 = vpop.f32.mrb[48].mxu0  ;;  %v471_v35 = vld [vmem:[#allocation2 + $0x3b8] sm:$0xff] }
 0x147   : > { %v2055_v59 = vld [vmem:[#allocation2 + $0x348] sm:$0xff]  ;;  %1930 = vst.msk [vmem:[#allocation2 + $0x378] sm:$0xff] %vm223_vm1, %v1801_v51  ;;  %2119 = vst.msk [vmem:[%s3227_s27 + $0x148] sm:$0xff] %vm223_vm1, %v1991_v58  ;;  %v2635_v1 = vpop.f32.mrb[48].mxu1  ;;  %v1740_v4 = vadd.f32 %v2571_v0, %v402_v60  ;;  %v1371_v6 = vpop.f32.mrb[49].mxu0  ;;  %v410_v60 = vld [vmem:[#allocation2 + $0x1d0] sm:$0xff] }
 0x148   : > { %2183 = vst.msk [vmem:[%s3227_s27 + $0x348] sm:$0xff] %vm223_vm1, %v2055_v59  ;;  %1864 = vst.msk [vmem:[#allocation2 + $0x168] sm:$0xff] %vm223_vm1, %v1735_v56  ;;  %v1804_v5 = vadd.f32 %v2635_v1, %v466_v61  ;;  %v1627_v7 = vpop.f32.mrb[49].mxu1  ;;  %v1738_v12 = vadd.f32 %v1371_v6, %v400_v62  ;;  %v2572_v14 = vpop.f32.mrb[50].mxu0  ;;  %v469_v41 = vld [vmem:[#allocation2 + $0x3a8] sm:$0xff]  ;;  %v474_v61 = vld [vmem:[#allocation2 + $0x3d0] sm:$0xff] }
 0x149   : > { %1928 = vst.msk [vmem:[#allocation2 + $0x368] sm:$0xff] %vm223_vm1, %v1799_v57  ;;  %v1996_v10 = vld [vmem:[#allocation2 + $0x170] sm:$0xff]  ;;  %v1802_v13 = vadd.f32 %v1627_v7, %v464_v63  ;;  %v2636_v15 = vpop.f32.mrb[50].mxu1  ;;  %1869 = vst.msk [vmem:[#allocation2 + $0x190] sm:$0xff] %vm223_vm1, %v1740_v4  ;;  %v1741_v18 = vadd.f32 %v2572_v14, %v403_v2  ;;  %v1374_v20 = vpop.f32.mrb[51].mxu0  ;;  %v408_v62 = vld [vmem:[#allocation2 + $0x1c0] sm:$0xff] }
 0x14a   : > { %v2060_v11 = vld [vmem:[#allocation2 + $0x370] sm:$0xff]  ;;  %2124 = vst.msk [vmem:[%s3227_s27 + $0x170] sm:$0xff] %vm223_vm1, %v1996_v10  ;;  %1933 = vst.msk [vmem:[#allocation2 + $0x390] sm:$0xff] %vm223_vm1, %v1804_v5  ;;  %v1805_v19 = vadd.f32 %v2636_v15, %v467_v3  ;;  %v1630_v21 = vpop.f32.mrb[51].mxu1  ;;  %v1739_v24 = vadd.f32 %v1374_v20, %v401_v8  ;;  %v472_v63 = vld [vmem:[#allocation2 + $0x3c0] sm:$0xff] }
 0x14b   : > { %2188 = vst.msk [vmem:[%s3227_s27 + $0x370] sm:$0xff] %vm223_vm1, %v2060_v11  ;;  %v1994_v16 = vld [vmem:[#allocation2 + $0x160] sm:$0xff]  ;;  %1867 = vst.msk [vmem:[#allocation2 + $0x180] sm:$0xff] %vm223_vm1, %v1738_v12  ;;  %v1803_v25 = vadd.f32 %v1630_v21, %v465_v9  ;;  %v411_v2 = vld [vmem:[#allocation2 + $0x1d8] sm:$0xff] }
 0x14c   : > { %v2058_v17 = vld [vmem:[#allocation2 + $0x360] sm:$0xff]  ;;  %2122 = vst.msk [vmem:[%s3227_s27 + $0x160] sm:$0xff] %vm223_vm1, %v1994_v16  ;;  %1931 = vst.msk [vmem:[#allocation2 + $0x380] sm:$0xff] %vm223_vm1, %v1802_v13  ;;  %v475_v3 = vld [vmem:[#allocation2 + $0x3d8] sm:$0xff] }
 0x14d   : > { %2186 = vst.msk [vmem:[%s3227_s27 + $0x360] sm:$0xff] %vm223_vm1, %v2058_v17  ;;  %v1997_v22 = vld [vmem:[#allocation2 + $0x178] sm:$0xff]  ;;  %1870 = vst.msk [vmem:[#allocation2 + $0x198] sm:$0xff] %vm223_vm1, %v1741_v18  ;;  %v409_v8 = vld [vmem:[#allocation2 + $0x1c8] sm:$0xff] }
 0x14e   : > { %v2061_v23 = vld [vmem:[#allocation2 + $0x378] sm:$0xff]  ;;  %2125 = vst.msk [vmem:[%s3227_s27 + $0x178] sm:$0xff] %vm223_vm1, %v1997_v22  ;;  %1934 = vst.msk [vmem:[#allocation2 + $0x398] sm:$0xff] %vm223_vm1, %v1805_v19  ;;  %v2575_v32 = vpop.f32.mrb[52].mxu0  ;;  %v473_v9 = vld [vmem:[#allocation2 + $0x3c8] sm:$0xff] }
 0x14f   : > { %2189 = vst.msk [vmem:[%s3227_s27 + $0x378] sm:$0xff] %vm223_vm1, %v2061_v23  ;;  %v1995_v26 = vld [vmem:[#allocation2 + $0x168] sm:$0xff]  ;;  %1868 = vst.msk [vmem:[#allocation2 + $0x188] sm:$0xff] %vm223_vm1, %v1739_v24  ;;  %v2639_v33 = vpop.f32.mrb[52].mxu1  ;;  %v1744_v36 = vadd.f32 %v2575_v32, %v406_v28  ;;  %v1387_v38 = vpop.f32.mrb[53].mxu0  ;;  %v414_v28 = vld [vmem:[#allocation2 + $0x1f0] sm:$0xff] }
 0x150   : > { %v2059_v27 = vld [vmem:[#allocation2 + $0x368] sm:$0xff]  ;;  %2123 = vst.msk [vmem:[%s3227_s27 + $0x168] sm:$0xff] %vm223_vm1, %v1995_v26  ;;  %1932 = vst.msk [vmem:[#allocation2 + $0x388] sm:$0xff] %vm223_vm1, %v1803_v25  ;;  %v1808_v37 = vadd.f32 %v2639_v33, %v470_v29  ;;  %v1643_v39 = vpop.f32.mrb[53].mxu1  ;;  %v2000_v42 = vld [vmem:[#allocation2 + $0x190] sm:$0xff]  ;;  %v1742_v44 = vadd.f32 %v1387_v38, %v404_v30  ;;  %v2576_v46 = vpop.f32.mrb[54].mxu0 }
 0x151   : > { %2187 = vst.msk [vmem:[%s3227_s27 + $0x368] sm:$0xff] %vm223_vm1, %v2059_v27  ;;  %v2064_v43 = vld [vmem:[#allocation2 + $0x390] sm:$0xff]  ;;  %v1806_v45 = vadd.f32 %v1643_v39, %v468_v31  ;;  %v2640_v47 = vpop.f32.mrb[54].mxu1  ;;  %2128 = vst.msk [vmem:[%s3227_s27 + $0x190] sm:$0xff] %vm223_vm1, %v2000_v42  ;;  %v1745_v50 = vadd.f32 %v2576_v46, %v407_v34  ;;  %v1390_v52 = vpop.f32.mrb[55].mxu0  ;;  %v412_v30 = vld [vmem:[#allocation2 + $0x1e0] sm:$0xff] }
 0x152   : > { %2192 = vst.msk [vmem:[%s3227_s27 + $0x390] sm:$0xff] %vm223_vm1, %v2064_v43  ;;  %v1998_v48 = vld [vmem:[#allocation2 + $0x180] sm:$0xff]  ;;  %1873 = vst.msk [vmem:[#allocation2 + $0x1b0] sm:$0xff] %vm223_vm1, %v1744_v36  ;;  %v1809_v51 = vadd.f32 %v2640_v47, %v471_v35  ;;  %v1646_v53 = vpop.f32.mrb[55].mxu1  ;;  %v1743_v56 = vadd.f32 %v1390_v52, %v405_v40  ;;  %v478_v29 = vld [vmem:[#allocation2 + $0x3f0] sm:$0xff] }
 0x153   : > { %v2062_v49 = vld [vmem:[#allocation2 + $0x380] sm:$0xff]  ;;  %1937 = vst.msk [vmem:[#allocation2 + $0x3b0] sm:$0xff] %vm223_vm1, %v1808_v37  ;;  %2126 = vst.msk [vmem:[%s3227_s27 + $0x180] sm:$0xff] %vm223_vm1, %v1998_v48  ;;  %v1807_v57 = vadd.f32 %v1646_v53, %v469_v41  ;;  %v415_v34 = vld [vmem:[#allocation2 + $0x1f8] sm:$0xff] }
 0x154   : > { %2190 = vst.msk [vmem:[%s3227_s27 + $0x380] sm:$0xff] %vm223_vm1, %v2062_v49  ;;  %v2001_v54 = vld [vmem:[#allocation2 + $0x198] sm:$0xff]  ;;  %1871 = vst.msk [vmem:[#allocation2 + $0x1a0] sm:$0xff] %vm223_vm1, %v1742_v44  ;;  %v476_v31 = vld [vmem:[#allocation2 + $0x3e0] sm:$0xff] }
 0x155   : > { %v2065_v55 = vld [vmem:[#allocation2 + $0x398] sm:$0xff]  ;;  %1935 = vst.msk [vmem:[#allocation2 + $0x3a0] sm:$0xff] %vm223_vm1, %v1806_v45  ;;  %2129 = vst.msk [vmem:[%s3227_s27 + $0x198] sm:$0xff] %vm223_vm1, %v2001_v54  ;;  %v413_v40 = vld [vmem:[#allocation2 + $0x1e8] sm:$0xff] }
 0x156   : > { %2193 = vst.msk [vmem:[%s3227_s27 + $0x398] sm:$0xff] %vm223_vm1, %v2065_v55  ;;  %v1999_v58 = vld [vmem:[#allocation2 + $0x188] sm:$0xff]  ;;  %1874 = vst.msk [vmem:[#allocation2 + $0x1b8] sm:$0xff] %vm223_vm1, %v1745_v50  ;;  %v2579_v0 = vpop.f32.mrb[56].mxu0  ;;  %v479_v35 = vld [vmem:[#allocation2 + $0x3f8] sm:$0xff] }
 0x157   : > { %v2063_v59 = vld [vmem:[#allocation2 + $0x388] sm:$0xff]  ;;  %1938 = vst.msk [vmem:[#allocation2 + $0x3b8] sm:$0xff] %vm223_vm1, %v1809_v51  ;;  %2127 = vst.msk [vmem:[%s3227_s27 + $0x188] sm:$0xff] %vm223_vm1, %v1999_v58  ;;  %v2643_v1 = vpop.f32.mrb[56].mxu1  ;;  %v1748_v4 = vadd.f32 %v2579_v0, %v410_v60  ;;  %v1403_v6 = vpop.f32.mrb[57].mxu0 }
 0x158   : > { %2191 = vst.msk [vmem:[%s3227_s27 + $0x388] sm:$0xff] %vm223_vm1, %v2063_v59  ;;  %1872 = vst.msk [vmem:[#allocation2 + $0x1a8] sm:$0xff] %vm223_vm1, %v1743_v56  ;;  %v1812_v5 = vadd.f32 %v2643_v1, %v474_v61  ;;  %v1659_v7 = vpop.f32.mrb[57].mxu1  ;;  %v1746_v12 = vadd.f32 %v1403_v6, %v408_v62  ;;  %v2580_v14 = vpop.f32.mrb[58].mxu0  ;;  %v477_v41 = vld [vmem:[#allocation2 + $0x3e8] sm:$0xff] }
 0x159   : > { %1936 = vst.msk [vmem:[#allocation2 + $0x3a8] sm:$0xff] %vm223_vm1, %v1807_v57  ;;  %v2004_v10 = vld [vmem:[#allocation2 + $0x1b0] sm:$0xff]  ;;  %v1810_v13 = vadd.f32 %v1659_v7, %v472_v63  ;;  %v2644_v15 = vpop.f32.mrb[58].mxu1  ;;  %1877 = vst.msk [vmem:[#allocation2 + $0x1d0] sm:$0xff] %vm223_vm1, %v1748_v4  ;;  %v1749_v18 = vadd.f32 %v2580_v14, %v411_v2  ;;  %v1406_v20 = vpop.f32.mrb[59].mxu0 }
 0x15a   : > { %v2068_v11 = vld [vmem:[#allocation2 + $0x3b0] sm:$0xff]  ;;  %2132 = vst.msk [vmem:[%s3227_s27 + $0x1b0] sm:$0xff] %vm223_vm1, %v2004_v10  ;;  %1941 = vst.msk [vmem:[#allocation2 + $0x3d0] sm:$0xff] %vm223_vm1, %v1812_v5  ;;  %v1813_v19 = vadd.f32 %v2644_v15, %v475_v3  ;;  %v1662_v21 = vpop.f32.mrb[59].mxu1  ;;  %v1747_v24 = vadd.f32 %v1406_v20, %v409_v8 }
 0x15b   : > { %2196 = vst.msk [vmem:[%s3227_s27 + $0x3b0] sm:$0xff] %vm223_vm1, %v2068_v11  ;;  %v2002_v16 = vld [vmem:[#allocation2 + $0x1a0] sm:$0xff]  ;;  %1875 = vst.msk [vmem:[#allocation2 + $0x1c0] sm:$0xff] %vm223_vm1, %v1746_v12  ;;  %v1811_v25 = vadd.f32 %v1662_v21, %v473_v9 }
 0x15c   : > { %v2066_v17 = vld [vmem:[#allocation2 + $0x3a0] sm:$0xff]  ;;  %2130 = vst.msk [vmem:[%s3227_s27 + $0x1a0] sm:$0xff] %vm223_vm1, %v2002_v16  ;;  %1939 = vst.msk [vmem:[#allocation2 + $0x3c0] sm:$0xff] %vm223_vm1, %v1810_v13 }
 0x15d   : > { %2194 = vst.msk [vmem:[%s3227_s27 + $0x3a0] sm:$0xff] %vm223_vm1, %v2066_v17  ;;  %v2005_v22 = vld [vmem:[#allocation2 + $0x1b8] sm:$0xff]  ;;  %1878 = vst.msk [vmem:[#allocation2 + $0x1d8] sm:$0xff] %vm223_vm1, %v1749_v18 }
 0x15e   : > { %v2069_v23 = vld [vmem:[#allocation2 + $0x3b8] sm:$0xff]  ;;  %2133 = vst.msk [vmem:[%s3227_s27 + $0x1b8] sm:$0xff] %vm223_vm1, %v2005_v22  ;;  %1942 = vst.msk [vmem:[#allocation2 + $0x3d8] sm:$0xff] %vm223_vm1, %v1813_v19  ;;  %v2583_v32 = vpop.f32.mrb[60].mxu0 }
 0x15f   : > { %2197 = vst.msk [vmem:[%s3227_s27 + $0x3b8] sm:$0xff] %vm223_vm1, %v2069_v23  ;;  %v2003_v26 = vld [vmem:[#allocation2 + $0x1a8] sm:$0xff]  ;;  %1876 = vst.msk [vmem:[#allocation2 + $0x1c8] sm:$0xff] %vm223_vm1, %v1747_v24  ;;  %v2647_v33 = vpop.f32.mrb[60].mxu1  ;;  %v1752_v36 = vadd.f32 %v2583_v32, %v414_v28  ;;  %v1419_v38 = vpop.f32.mrb[61].mxu0 }
 0x160   : > { %v2067_v27 = vld [vmem:[#allocation2 + $0x3a8] sm:$0xff]  ;;  %2131 = vst.msk [vmem:[%s3227_s27 + $0x1a8] sm:$0xff] %vm223_vm1, %v2003_v26  ;;  %1940 = vst.msk [vmem:[#allocation2 + $0x3c8] sm:$0xff] %vm223_vm1, %v1811_v25  ;;  %v1816_v37 = vadd.f32 %v2647_v33, %v478_v29  ;;  %v1675_v39 = vpop.f32.mrb[61].mxu1  ;;  %v2008_v42 = vld [vmem:[#allocation2 + $0x1d0] sm:$0xff]  ;;  %v1750_v44 = vadd.f32 %v1419_v38, %v412_v30  ;;  %v2584_v46 = vpop.f32.mrb[62].mxu0 }
 0x161   : > { %2195 = vst.msk [vmem:[%s3227_s27 + $0x3a8] sm:$0xff] %vm223_vm1, %v2067_v27  ;;  %v2072_v43 = vld [vmem:[#allocation2 + $0x3d0] sm:$0xff]  ;;  %v1814_v45 = vadd.f32 %v1675_v39, %v476_v31  ;;  %v2648_v47 = vpop.f32.mrb[62].mxu1  ;;  %2136 = vst.msk [vmem:[%s3227_s27 + $0x1d0] sm:$0xff] %vm223_vm1, %v2008_v42  ;;  %v1753_v50 = vadd.f32 %v2584_v46, %v415_v34  ;;  %v1422_v52 = vpop.f32.mrb[63].mxu0 }
 0x162   : > { %2200 = vst.msk [vmem:[%s3227_s27 + $0x3d0] sm:$0xff] %vm223_vm1, %v2072_v43  ;;  %v2006_v48 = vld [vmem:[#allocation2 + $0x1c0] sm:$0xff]  ;;  %1881 = vst.msk [vmem:[#allocation2 + $0x1f0] sm:$0xff] %vm223_vm1, %v1752_v36  ;;  %v1817_v51 = vadd.f32 %v2648_v47, %v479_v35  ;;  %v1678_v53 = vpop.f32.mrb[63].mxu1  ;;  %v1751_v56 = vadd.f32 %v1422_v52, %v413_v40 }
 0x163   : > { %v2070_v49 = vld [vmem:[#allocation2 + $0x3c0] sm:$0xff]  ;;  %1945 = vst.msk [vmem:[#allocation2 + $0x3f0] sm:$0xff] %vm223_vm1, %v1816_v37  ;;  %2134 = vst.msk [vmem:[%s3227_s27 + $0x1c0] sm:$0xff] %vm223_vm1, %v2006_v48  ;;  %v1815_v57 = vadd.f32 %v1678_v53, %v477_v41 }
 0x164   : > { %2198 = vst.msk [vmem:[%s3227_s27 + $0x3c0] sm:$0xff] %vm223_vm1, %v2070_v49  ;;  %v2009_v54 = vld [vmem:[#allocation2 + $0x1d8] sm:$0xff]  ;;  %1879 = vst.msk [vmem:[#allocation2 + $0x1e0] sm:$0xff] %vm223_vm1, %v1750_v44 }
 0x165   : > { %v2073_v55 = vld [vmem:[#allocation2 + $0x3d8] sm:$0xff]  ;;  %1943 = vst.msk [vmem:[#allocation2 + $0x3e0] sm:$0xff] %vm223_vm1, %v1814_v45  ;;  %2137 = vst.msk [vmem:[%s3227_s27 + $0x1d8] sm:$0xff] %vm223_vm1, %v2009_v54 }
 0x166   : > { %2201 = vst.msk [vmem:[%s3227_s27 + $0x3d8] sm:$0xff] %vm223_vm1, %v2073_v55  ;;  %v2007_v58 = vld [vmem:[#allocation2 + $0x1c8] sm:$0xff]  ;;  %1882 = vst.msk [vmem:[#allocation2 + $0x1f8] sm:$0xff] %vm223_vm1, %v1753_v50 }
 0x167   : > { %v2071_v59 = vld [vmem:[#allocation2 + $0x3c8] sm:$0xff]  ;;  %1946 = vst.msk [vmem:[#allocation2 + $0x3f8] sm:$0xff] %vm223_vm1, %v1817_v51  ;;  %2135 = vst.msk [vmem:[%s3227_s27 + $0x1c8] sm:$0xff] %vm223_vm1, %v2007_v58 }
 0x168   : > { %2199 = vst.msk [vmem:[%s3227_s27 + $0x3c8] sm:$0xff] %vm223_vm1, %v2071_v59  ;;  %1880 = vst.msk [vmem:[#allocation2 + $0x1e8] sm:$0xff] %vm223_vm1, %v1751_v56 }
 0x169   : > { %1944 = vst.msk [vmem:[#allocation2 + $0x3e8] sm:$0xff] %vm223_vm1, %v1815_v57  ;;  %v2012_v60 = vld [vmem:[#allocation2 + $0x1f0] sm:$0xff] }
 0x16a   : > { %v2076_v61 = vld [vmem:[#allocation2 + $0x3f0] sm:$0xff]  ;;  %2140 = vst.msk [vmem:[%s3227_s27 + $0x1f0] sm:$0xff] %vm223_vm1, %v2012_v60 }
 0x16b   : > { %2204 = vst.msk [vmem:[%s3227_s27 + $0x3f0] sm:$0xff] %vm223_vm1, %v2076_v61  ;;  %v2010_v62 = vld [vmem:[#allocation2 + $0x1e0] sm:$0xff] }
 0x16c   : > { %v2074_v63 = vld [vmem:[#allocation2 + $0x3e0] sm:$0xff]  ;;  %2138 = vst.msk [vmem:[%s3227_s27 + $0x1e0] sm:$0xff] %vm223_vm1, %v2010_v62 }
 0x16d   : > { %2202 = vst.msk [vmem:[%s3227_s27 + $0x3e0] sm:$0xff] %vm223_vm1, %v2074_v63  ;;  %v2013_v0 = vld [vmem:[#allocation2 + $0x1f8] sm:$0xff] }
 0x16e   : > { %v2077_v1 = vld [vmem:[#allocation2 + $0x3f8] sm:$0xff]  ;;  %2141 = vst.msk [vmem:[%s3227_s27 + $0x1f8] sm:$0xff] %vm223_vm1, %v2013_v0 }
 0x16f   : > { %2205 = vst.msk [vmem:[%s3227_s27 + $0x3f8] sm:$0xff] %vm223_vm1, %v2077_v1  ;;  %v2011_v2 = vld [vmem:[#allocation2 + $0x1e8] sm:$0xff] }
 0x170   : > { %v2075_v3 = vld [vmem:[#allocation2 + $0x3e8] sm:$0xff]  ;;  %2139 = vst.msk [vmem:[%s3227_s27 + $0x1e8] sm:$0xff] %vm223_vm1, %v2011_v2 }
 0x171   : > { %2203 = vst.msk [vmem:[%s3227_s27 + $0x3e8] sm:$0xff] %vm223_vm1, %v2075_v3 }
 0x172 PF: > { %s12_s11 = sadd.s32 1, %s2769_s11   ;;  %s3617_s9 = smov %s2765_s10 }
 0x173   : > { %p9_p5 = scmp.ge.s32.totalorder %s12_s11, 18   ;;  %s3618_s10 = smov %s3620_s12 }
 0x175   :  { %11 = sbr.rel (!%p9_p5) target bundleno = 2 (0x2), region = 69 }

</bundles_post_ra>
